<compile_context>
chip_gen: v7x
topology: tpu7x:2x2x1
jax: 0.10.0
libtpu: 0.0.40
codegen_flags: <defaults>
</compile_context>

<pallas_src>
import functools

import jax
import jax.numpy as jnp
from jax import lax
from jax.experimental import pallas as pl
from jax.experimental.pallas import tpu as pltpu

_LANE = 128
_NEG_BIG = -1e30  # finite "masked" logit (avoids inf*0 -> nan)


def _gelu_tanh(x):
    # TODO(synk): PyTorch nn.GELU defaults to the exact erf form; the tanh
    # approximation used here (EUP-friendly) differs slightly.
    return 0.5 * x * (1.0 + jnp.tanh(0.7978845608028654 * (x + 0.044715 * x * x * x)))


def _pad8(n):
    return ((n + 7) // 8) * 8


def _fused_forward_kernel(
    ecg_ref, cmr_ref, tar_ref, snp_ref,
    w_ecg_ref, w_cmr_ref, w_small_ref, bias_ref,
    reg_out_ref, loss_out_ref,
    *, batch, inv_temperature, alpha, dims,
):
    f32 = jnp.float32
    bf16 = jnp.bfloat16
    D, L, H, T, S = dims["D"], dims["L"], dims["H"], dims["T"], dims["S"]
    r_head, r_t1, r_t2, r_snp = dims["row_offsets"]

    # ---- unpack the two parameter slabs (static slices, VMEM-resident) -----
    w_small = w_small_ref[...]
    bias = bias_ref[...]

    w_head = w_small[r_head:r_head + D, :].astype(bf16)        # (D, 128 + L)
    w_t1 = w_small[r_t1:r_t1 + T, 0:H].astype(bf16)            # (T, H)
    w_t2 = w_small[r_t2:r_t2 + H, 0:L].astype(bf16)            # (H, L)
    w_snp = w_small[r_snp:r_snp + S, 0:L].astype(bf16)         # (S, L)

    b_ecg = bias[0:1, 0:D]
    b_head = bias[1:2, :]                                      # (1, 128 + L)
    b_cmr = bias[2:3, 0:L]
    b_t1 = bias[3:4, 0:H]
    b_t2 = bias[4:5, 0:L]
    b_snp = bias[5:6, 0:L]

    # ---- encoders: bf16 MXU matmuls, f32 accumulation ----------------------
    ecg_inter = jnp.dot(ecg_ref[...].astype(bf16), w_ecg_ref[...],
                        preferred_element_type=f32) + b_ecg    # (Bp, D)

    # fused [regression head | ECG projection head]: ONE MXU pass off ecg_inter
    head = jnp.dot(ecg_inter.astype(bf16), w_head,
                   preferred_element_type=f32) + b_head        # (Bp, 128 + L)
    reg_out_ref[...] = head[:, 0:_LANE]                        # lane-dense out
    ecg_feat = head[:, _LANE:_LANE + L]                        # tile-aligned

    cmr_feat = jnp.dot(cmr_ref[...].astype(bf16), w_cmr_ref[...],
                       preferred_element_type=f32) + b_cmr     # (Bp, L)

    h = jnp.dot(tar_ref[...].astype(bf16), w_t1, preferred_element_type=f32) + b_t1
    h = _gelu_tanh(h)
    tar_feat = jnp.dot(h.astype(bf16), w_t2, preferred_element_type=f32) + b_t2

    snp_feat = jnp.dot(snp_ref[...].astype(bf16), w_snp,
                       preferred_element_type=f32) + b_snp

    # ---- CLIP loss over the 6 modality pairs (normalize each ONCE) ---------
    def l2norm(x):
        return x * lax.rsqrt(jnp.sum(x * x, axis=-1, keepdims=True) + 1e-12)

    feats = [l2norm(ecg_feat), l2norm(cmr_feat), l2norm(tar_feat), l2norm(snp_feat)]
    n = ecg_feat.shape[0]  # padded batch

    # ONE Gram matrix for all 6 pairs: no per-pair matmuls, no transposes.
    F = jnp.concatenate(feats, axis=0)                          # (4*Bp, L)
    G = lax.dot_general(F, F, (((1,), (1,)), ((), ())),
                        preferred_element_type=f32) * inv_temperature

    row = lax.broadcasted_iota(jnp.int32, (n, n), 0)
    col = lax.broadcasted_iota(jnp.int32, (n, n), 1)
    eye = (row == col).astype(f32)
    col_valid = col < batch
    row_valid = row < batch
    rmask = (lax.broadcasted_iota(jnp.int32, (n, 1), 0) < batch).astype(f32)
    cmask = (lax.broadcasted_iota(jnp.int32, (1, n), 1) < batch).astype(f32)
    inv_batch = 1.0 / float(batch)

    def ce_row(lg):
        # CE with identity labels, softmax over columns, mean over real rows.
        lg = jnp.where(col_valid, lg, _NEG_BIG)
        m = jnp.max(lg, axis=-1, keepdims=True)
        lse = m + jnp.log(jnp.sum(jnp.exp(lg - m), axis=-1, keepdims=True))
        diag = jnp.sum(lg * eye, axis=-1, keepdims=True)
        return jnp.sum((lse - diag) * rmask) * inv_batch

    def ce_col(lg):
        # == ce_row(lg.T) but without materializing any transpose.
        lg = jnp.where(row_valid, lg, _NEG_BIG)
        m = jnp.max(lg, axis=0, keepdims=True)
        lse = m + jnp.log(jnp.sum(jnp.exp(lg - m), axis=0, keepdims=True))
        diag = jnp.sum(lg * eye, axis=0, keepdims=True)
        return jnp.sum((lse - diag) * cmask) * inv_batch

    total = 0.0
    for i in range(4):
        for j in range(i + 1, 4):
            lg = G[i * n:(i + 1) * n, j * n:(j + 1) * n]
            total = total + alpha * ce_row(lg) + (1.0 - alpha) * ce_col(lg)

    # scalar loss broadcast into one lane-dense row
    loss_out_ref[...] = total * jnp.ones((1, _LANE), f32)


def _full_spec(shape):
    return pl.BlockSpec(shape, lambda i: (0,) * len(shape))


# ----------------------------------------------------------------------------
# Model (parameter setup + forward glue)
# ----------------------------------------------------------------------------
class Args:
    loss_type = "total"
    loss = "clip_loss"
    Vit_embbeding = 32
    regression_dim = 8
    latent_dim = 32
    tar_hidden_features = 64
    temperature = 0.07
    alpha_weight = 0.5


class TrimodalClipPallas:
    """Synthetic-weight re-implementation of Trimodal_clip.forward (fused)."""

    # TODO(synk): the full ViT / Swin / TabNet sub-encoders and pretrained
    # checkpoint loading have no clean in-script Pallas equivalent; each
    # encoder is a deterministic projection with matching feature dims.

    def __init__(self, args, ecg_flat_dim, cmr_flat_dim, tar_number, snp_dim, key):
        self.args = args
        ks = jax.random.split(key, 14)

        def init_w(k, shape, scale=0.02, dtype=jnp.float32):
            return (scale * jax.random.normal(k, shape)).astype(dtype)

        D, L, H = args.Vit_embbeding, args.latent_dim, args.tar_hidden_features
        R = args.regression_dim
        width = _LANE + L  # lanes: [0:128]=regression head, [128:128+L]=ecg head

        # --- big encoder weights stay as separate bf16 inputs (MXU path) ----
        self.W_ecg = init_w(ks[0], (ecg_flat_dim, D), dtype=jnp.bfloat16)
        self.W_cmr = init_w(ks[1], (cmr_flat_dim, L), dtype=jnp.bfloat16)

        # --- pack all small weights into ONE f32 slab (8-aligned row blocks) -
        r_head = 0
        r_t1 = r_head + _pad8(D)
        r_t2 = r_t1 + _pad8(tar_number)
        r_snp = r_t2 + _pad8(H)
        rows = r_snp + _pad8(snp_dim)

        w_reg = init_w(ks[2], (D, R))
        w_ecg_head = init_w(ks[3], (D, L))
        w_t1 = init_w(ks[4], (tar_number, H))
        w_t2 = init_w(ks[5], (H, L))
        w_snp = init_w(ks[6], (snp_dim, L))

        head_fused = (
            jnp.zeros((D, width), jnp.float32)
            .at[:, :R].set(w_reg)
            .at[:, _LANE:_LANE + L].set(w_ecg_head)
        )
        slab = jnp.zeros((rows, width), jnp.float32)
        slab = slab.at[r_head:r_head + D, :].set(head_fused)
        slab = slab.at[r_t1:r_t1 + tar_number, :H].set(w_t1)
        slab = slab.at[r_t2:r_t2 + H, :L].set(w_t2)
        slab = slab.at[r_snp:r_snp + snp_dim, :L].set(w_snp)
        self.W_small = slab

        # --- pack all biases into ONE f32 slab (one bias per row) -----------
        b_ecg = init_w(ks[7], (D,))
        b_reg = init_w(ks[8], (R,))
        b_ecg_head = init_w(ks[9], (L,))
        b_cmr = init_w(ks[10], (L,))
        b_t1 = init_w(ks[11], (H,))
        b_t2 = init_w(ks[12], (L,))
        b_snp = init_w(ks[13], (L,))

        bias = jnp.zeros((8, width), jnp.float32)
        bias = bias.at[0, :D].set(b_ecg)
        bias = bias.at[1, :R].set(b_reg)
        bias = bias.at[1, _LANE:_LANE + L].set(b_ecg_head)
        bias = bias.at[2, :L].set(b_cmr)
        bias = bias.at[3, :H].set(b_t1)
        bias = bias.at[4, :L].set(b_t2)
        bias = bias.at[5, :L].set(b_snp)
        self.bias_slab = bias

        self.dims = {
            "D": D, "L": L, "H": H, "T": tar_number, "S": snp_dim,
            "row_offsets": (r_head, r_t1, r_t2, r_snp),
        }

    def __call__(self, ecg, cmr, tar, snp):
        B = ecg.shape[0]
        Bp = max(8, ((B + 7) // 8) * 8)  # pad batch to a multiple of 8 sublanes

        def pad_rows(x):
            x = x.astype(jnp.float32)
            return jnp.pad(x, ((0, Bp - x.shape[0]), (0, 0)))

        # No wrapper-side bf16 casts: inputs stay f32, cast happens in-kernel.
        ecg_flat = pad_rows(ecg.reshape(B, -1))
        cmr_flat = pad_rows(cmr.reshape(B, -1))
        tar_p = pad_rows(tar)
        snp_p = pad_rows(snp)

        kernel = functools.partial(
            _fused_forward_kernel,
            batch=B,
            inv_temperature=1.0 / float(self.args.temperature),
            alpha=float(self.args.alpha_weight),
            dims=self.dims,
        )

        inputs = (
            ecg_flat, cmr_flat, tar_p, snp_p,
            self.W_ecg, self.W_cmr, self.W_small, self.bias_slab,
        )

        # TODO(synk): a batch grid axis (v7x second TensorCore) would require a
        # distributed softmax for the batch-global CLIP loss; single step here.
        reg_out, loss_out = pl.pallas_call(
            kernel,
            out_shape=(
                jax.ShapeDtypeStruct((Bp, _LANE), jnp.float32),
                jax.ShapeDtypeStruct((1, _LANE), jnp.float32),
            ),
            grid=(1,),
            in_specs=[_full_spec(x.shape) for x in inputs],
            out_specs=(_full_spec((Bp, _LANE)), _full_spec((1, _LANE))),
            compiler_params=pltpu.CompilerParams(
                dimension_semantics=("arbitrary",),
            ),
        )(*inputs)

        total_loss = loss_out[0, 0]
        ecg_regression = reg_out[:B, : self.args.regression_dim]
        return total_loss, ecg_regression


# ----------------------------------------------------------------------------
if __name__ == "__main__":
    args = Args()

    B = 2
    ecg_shape = (B, 1, 12, 64)    # (B, C, leads, samples)  -> flat 768
    cmr_shape = (B, 4, 16, 16)    # NCHW                    -> flat 1024
    tar_number = 24
    snp_dim = 48

    key = jax.random.PRNGKey(0)
    k_ecg, k_cmr, k_tar, k_snp, k_params = jax.random.split(key, 5)
    ecg = jax.random.normal(k_ecg, ecg_shape, dtype=jnp.float32)
    cmr = jax.random.normal(k_cmr, cmr_shape, dtype=jnp.float32)
    tar = jax.random.normal(k_tar, (B, tar_number), dtype=jnp.float32)
    snp = jax.random.normal(k_snp, (B, snp_dim), dtype=jnp.float32)

    model = TrimodalClipPallas(
        args,
        ecg_flat_dim=1 * 12 * 64,
        cmr_flat_dim=4 * 16 * 16,
        tar_number=tar_number,
        snp_dim=snp_dim,
        key=k_params,
    )

    fwd = jax.jit(lambda e, c, t, s: model(e, c, t, s))
    loss, ecg_regression = fwd(ecg, cmr, tar, snp)
    jax.block_until_ready(loss)
    jax.block_until_ready(ecg_regression)

    assert ecg_regression.shape == (B, args.regression_dim)
    assert loss.shape == ()
    assert bool(jnp.isfinite(loss))
    assert bool(jnp.all(jnp.isfinite(ecg_regression)))
    print("KERNEL_OK")
</pallas_src>

<mosaic_0001>
module attributes {stable_mosaic.version = 11 : i64} {
  func.func @_fused_forward_kernel(%arg0: i32, %arg1: memref<8x768xf32, #tpu.memory_space<vmem>>, %arg2: memref<8x1024xf32, #tpu.memory_space<vmem>>, %arg3: memref<8x24xf32, #tpu.memory_space<vmem>>, %arg4: memref<8x48xf32, #tpu.memory_space<vmem>>, %arg5: memref<768x32xbf16, #tpu.memory_space<vmem>>, %arg6: memref<1024x32xbf16, #tpu.memory_space<vmem>>, %arg7: memref<168x160xf32, #tpu.memory_space<vmem>>, %arg8: memref<8x160xf32, #tpu.memory_space<vmem>>, %arg9: memref<8x128xf32, #tpu.memory_space<vmem>>, %arg10: memref<1x128xf32, #tpu.memory_space<vmem>>) attributes {dimension_semantics = [#tpu.dimension_semantics<arbitrary>], iteration_bounds = array<i64: 1>, scalar_prefetch = 0 : i64, scratch_operands = 0 : i64, tpu.core_type = #tpu.core_type<tc>, window_params = [{pipeline_mode = #tpu.pipeline_mode<synchronous>, transform_indices = @transform_0, window_bounds = array<i64: 8, 768>}, {pipeline_mode = #tpu.pipeline_mode<synchronous>, transform_indices = @transform_1, window_bounds = array<i64: 8, 1024>}, {pipeline_mode = #tpu.pipeline_mode<synchronous>, transform_indices = @transform_2, window_bounds = array<i64: 8, 24>}, {pipeline_mode = #tpu.pipeline_mode<synchronous>, transform_indices = @transform_3, window_bounds = array<i64: 8, 48>}, {pipeline_mode = #tpu.pipeline_mode<synchronous>, transform_indices = @transform_4, window_bounds = array<i64: 768, 32>}, {pipeline_mode = #tpu.pipeline_mode<synchronous>, transform_indices = @transform_5, window_bounds = array<i64: 1024, 32>}, {pipeline_mode = #tpu.pipeline_mode<synchronous>, transform_indices = @transform_6, window_bounds = array<i64: 168, 160>}, {pipeline_mode = #tpu.pipeline_mode<synchronous>, transform_indices = @transform_7, window_bounds = array<i64: 8, 160>}, {pipeline_mode = #tpu.pipeline_mode<synchronous>, transform_indices = @transform_8, window_bounds = array<i64: 8, 128>}, {pipeline_mode = #tpu.pipeline_mode<synchronous>, transform_indices = @transform_9, window_bounds = array<i64: 1, 128>}]} {
    %c0 = arith.constant 0 : index
    %c0_0 = arith.constant 0 : index
    %0 = vector.load %arg7[%c0, %c0_0] : memref<168x160xf32, #tpu.memory_space<vmem>>, vector<168x160xf32>
    %c0_1 = arith.constant 0 : index
    %c0_2 = arith.constant 0 : index
    %1 = vector.load %arg8[%c0_1, %c0_2] : memref<8x160xf32, #tpu.memory_space<vmem>>, vector<8x160xf32>
    %2 = vector.extract_strided_slice %0 {offsets = [0, 0], sizes = [32, 160], strides = [1, 1]} : vector<168x160xf32> to vector<32x160xf32>
    %3 = arith.truncf %2 : vector<32x160xf32> to vector<32x160xbf16>
    %4 = vector.extract_strided_slice %0 {offsets = [32, 0], sizes = [24, 64], strides = [1, 1]} : vector<168x160xf32> to vector<24x64xf32>
    %5 = arith.truncf %4 : vector<24x64xf32> to vector<24x64xbf16>
    %6 = vector.extract_strided_slice %0 {offsets = [56, 0], sizes = [64, 32], strides = [1, 1]} : vector<168x160xf32> to vector<64x32xf32>
    %7 = arith.truncf %6 : vector<64x32xf32> to vector<64x32xbf16>
    %8 = vector.extract_strided_slice %0 {offsets = [120, 0], sizes = [48, 32], strides = [1, 1]} : vector<168x160xf32> to vector<48x32xf32>
    %9 = arith.truncf %8 : vector<48x32xf32> to vector<48x32xbf16>
    %10 = vector.extract_strided_slice %1 {offsets = [0, 0], sizes = [1, 32], strides = [1, 1]} : vector<8x160xf32> to vector<1x32xf32>
    %11 = vector.extract_strided_slice %1 {offsets = [1, 0], sizes = [1, 160], strides = [1, 1]} : vector<8x160xf32> to vector<1x160xf32>
    %12 = vector.extract_strided_slice %1 {offsets = [2, 0], sizes = [1, 32], strides = [1, 1]} : vector<8x160xf32> to vector<1x32xf32>
    %13 = vector.extract_strided_slice %1 {offsets = [3, 0], sizes = [1, 64], strides = [1, 1]} : vector<8x160xf32> to vector<1x64xf32>
    %14 = vector.extract_strided_slice %1 {offsets = [4, 0], sizes = [1, 32], strides = [1, 1]} : vector<8x160xf32> to vector<1x32xf32>
    %15 = vector.extract_strided_slice %1 {offsets = [5, 0], sizes = [1, 32], strides = [1, 1]} : vector<8x160xf32> to vector<1x32xf32>
    %c0_3 = arith.constant 0 : index
    %c0_4 = arith.constant 0 : index
    %16 = vector.load %arg1[%c0_3, %c0_4] : memref<8x768xf32, #tpu.memory_space<vmem>>, vector<8x768xf32>
    %17 = arith.truncf %16 : vector<8x768xf32> to vector<8x768xbf16>
    %c0_5 = arith.constant 0 : index
    %c0_6 = arith.constant 0 : index
    %18 = vector.load %arg5[%c0_5, %c0_6] : memref<768x32xbf16, #tpu.memory_space<vmem>>, vector<768x32xbf16>
    %cst = arith.constant dense<0.000000e+00> : vector<8x32xf32>
    %19 = tpu.matmul %17, %18, %cst {dimension_numbers = #tpu.dot_dimension_numbers<[1], [0], [0], [1], [0, 0, 1, 1], [], []>} : vector<8x768xbf16>, vector<768x32xbf16>, vector<8x32xf32> -> vector<8x32xf32>
    %20 = vector.broadcast %10 : vector<1x32xf32> to vector<8x32xf32>
    %21 = arith.addf %19, %20 : vector<8x32xf32>
    %22 = arith.truncf %21 : vector<8x32xf32> to vector<8x32xbf16>
    %cst_7 = arith.constant dense<0.000000e+00> : vector<8x160xf32>
    %23 = tpu.matmul %22, %3, %cst_7 {dimension_numbers = #tpu.dot_dimension_numbers<[1], [0], [0], [1], [0, 0, 1, 1], [], []>} : vector<8x32xbf16>, vector<32x160xbf16>, vector<8x160xf32> -> vector<8x160xf32>
    %24 = vector.broadcast %11 : vector<1x160xf32> to vector<8x160xf32>
    %25 = arith.addf %23, %24 : vector<8x160xf32>
    %26 = vector.extract_strided_slice %25 {offsets = [0, 0], sizes = [8, 128], strides = [1, 1]} : vector<8x160xf32> to vector<8x128xf32>
    %c0_8 = arith.constant 0 : index
    %c0_9 = arith.constant 0 : index
    %27 = vector.load %arg9[%c0_8, %c0_9] : memref<8x128xf32, #tpu.memory_space<vmem>>, vector<8x128xf32>
    tpu.vector_store %arg9[%c0_8, %c0_9], %26 {strides = array<i32>} : memref<8x128xf32, #tpu.memory_space<vmem>>, vector<8x128xf32>,
    %28 = vector.extract_strided_slice %25 {offsets = [0, 128], sizes = [8, 32], strides = [1, 1]} : vector<8x160xf32> to vector<8x32xf32>
    %c0_10 = arith.constant 0 : index
    %c0_11 = arith.constant 0 : index
    %29 = vector.load %arg2[%c0_10, %c0_11] : memref<8x1024xf32, #tpu.memory_space<vmem>>, vector<8x1024xf32>
    %30 = arith.truncf %29 : vector<8x1024xf32> to vector<8x1024xbf16>
    %c0_12 = arith.constant 0 : index
    %c0_13 = arith.constant 0 : index
    %31 = vector.load %arg6[%c0_12, %c0_13] : memref<1024x32xbf16, #tpu.memory_space<vmem>>, vector<1024x32xbf16>
    %cst_14 = arith.constant dense<0.000000e+00> : vector<8x32xf32>
    %32 = tpu.matmul %30, %31, %cst_14 {dimension_numbers = #tpu.dot_dimension_numbers<[1], [0], [0], [1], [0, 0, 1, 1], [], []>} : vector<8x1024xbf16>, vector<1024x32xbf16>, vector<8x32xf32> -> vector<8x32xf32>
    %33 = vector.broadcast %12 : vector<1x32xf32> to vector<8x32xf32>
    %34 = arith.addf %32, %33 : vector<8x32xf32>
    %c0_15 = arith.constant 0 : index
    %c0_16 = arith.constant 0 : index
    %35 = vector.load %arg3[%c0_15, %c0_16] : memref<8x24xf32, #tpu.memory_space<vmem>>, vector<8x24xf32>
    %36 = arith.truncf %35 : vector<8x24xf32> to vector<8x24xbf16>
    %cst_17 = arith.constant dense<0.000000e+00> : vector<8x64xf32>
    %37 = tpu.matmul %36, %5, %cst_17 {dimension_numbers = #tpu.dot_dimension_numbers<[1], [0], [0], [1], [0, 0, 1, 1], [], []>} : vector<8x24xbf16>, vector<24x64xbf16>, vector<8x64xf32> -> vector<8x64xf32>
    %38 = vector.broadcast %13 : vector<1x64xf32> to vector<8x64xf32>
    %39 = arith.addf %37, %38 : vector<8x64xf32>
    %cst_18 = arith.constant 5.000000e-01 : f32
    %40 = vector.broadcast %cst_18 : f32 to vector<8x64xf32>
    %41 = arith.mulf %40, %39 : vector<8x64xf32>
    %cst_19 = arith.constant 4.471500e-02 : f32
    %42 = vector.broadcast %cst_19 : f32 to vector<8x64xf32>
    %43 = arith.mulf %42, %39 : vector<8x64xf32>
    %44 = arith.mulf %43, %39 : vector<8x64xf32>
    %45 = arith.mulf %44, %39 : vector<8x64xf32>
    %46 = arith.addf %39, %45 : vector<8x64xf32>
    %cst_20 = arith.constant 0.797884583 : f32
    %47 = vector.broadcast %cst_20 : f32 to vector<8x64xf32>
    %48 = arith.mulf %47, %46 : vector<8x64xf32>
    %49 = math.tanh %48 : vector<8x64xf32>
    %cst_21 = arith.constant 1.000000e+00 : f32
    %50 = vector.broadcast %cst_21 : f32 to vector<8x64xf32>
    %51 = arith.addf %50, %49 : vector<8x64xf32>
    %52 = arith.mulf %41, %51 : vector<8x64xf32>
    %53 = arith.truncf %52 : vector<8x64xf32> to vector<8x64xbf16>
    %cst_22 = arith.constant dense<0.000000e+00> : vector<8x32xf32>
    %54 = tpu.matmul %53, %7, %cst_22 {dimension_numbers = #tpu.dot_dimension_numbers<[1], [0], [0], [1], [0, 0, 1, 1], [], []>} : vector<8x64xbf16>, vector<64x32xbf16>, vector<8x32xf32> -> vector<8x32xf32>
    %55 = vector.broadcast %14 : vector<1x32xf32> to vector<8x32xf32>
    %56 = arith.addf %54, %55 : vector<8x32xf32>
    %c0_23 = arith.constant 0 : index
    %c0_24 = arith.constant 0 : index
    %57 = vector.load %arg4[%c0_23, %c0_24] : memref<8x48xf32, #tpu.memory_space<vmem>>, vector<8x48xf32>
    %58 = arith.truncf %57 : vector<8x48xf32> to vector<8x48xbf16>
    %cst_25 = arith.constant dense<0.000000e+00> : vector<8x32xf32>
    %59 = tpu.matmul %58, %9, %cst_25 {dimension_numbers = #tpu.dot_dimension_numbers<[1], [0], [0], [1], [0, 0, 1, 1], [], []>} : vector<8x48xbf16>, vector<48x32xbf16>, vector<8x32xf32> -> vector<8x32xf32>
    %60 = vector.broadcast %15 : vector<1x32xf32> to vector<8x32xf32>
    %61 = arith.addf %59, %60 : vector<8x32xf32>
    %62 = arith.mulf %28, %28 : vector<8x32xf32>
    %cst_26 = arith.constant dense<0.000000e+00> : vector<8xf32>
    %63 = vector.multi_reduction <add>, %62, %cst_26 [1] : vector<8x32xf32> to vector<8xf32>
    %64 = vector.shape_cast %63 : vector<8xf32> to vector<8x1xf32>
    %cst_27 = arith.constant 9.99999996E-13 : f32
    %65 = vector.broadcast %cst_27 : f32 to vector<8x1xf32>
    %66 = arith.addf %64, %65 : vector<8x1xf32>
    %67 = math.rsqrt %66 : vector<8x1xf32>
    %68 = vector.broadcast %67 : vector<8x1xf32> to vector<8x32xf32>
    %69 = arith.mulf %28, %68 : vector<8x32xf32>
    %70 = arith.mulf %34, %34 : vector<8x32xf32>
    %cst_28 = arith.constant dense<0.000000e+00> : vector<8xf32>
    %71 = vector.multi_reduction <add>, %70, %cst_28 [1] : vector<8x32xf32> to vector<8xf32>
    %72 = vector.shape_cast %71 : vector<8xf32> to vector<8x1xf32>
    %cst_29 = arith.constant 9.99999996E-13 : f32
    %73 = vector.broadcast %cst_29 : f32 to vector<8x1xf32>
    %74 = arith.addf %72, %73 : vector<8x1xf32>
    %75 = math.rsqrt %74 : vector<8x1xf32>
    %76 = vector.broadcast %75 : vector<8x1xf32> to vector<8x32xf32>
    %77 = arith.mulf %34, %76 : vector<8x32xf32>
    %78 = arith.mulf %56, %56 : vector<8x32xf32>
    %cst_30 = arith.constant dense<0.000000e+00> : vector<8xf32>
    %79 = vector.multi_reduction <add>, %78, %cst_30 [1] : vector<8x32xf32> to vector<8xf32>
    %80 = vector.shape_cast %79 : vector<8xf32> to vector<8x1xf32>
    %cst_31 = arith.constant 9.99999996E-13 : f32
    %81 = vector.broadcast %cst_31 : f32 to vector<8x1xf32>
    %82 = arith.addf %80, %81 : vector<8x1xf32>
    %83 = math.rsqrt %82 : vector<8x1xf32>
    %84 = vector.broadcast %83 : vector<8x1xf32> to vector<8x32xf32>
    %85 = arith.mulf %56, %84 : vector<8x32xf32>
    %86 = arith.mulf %61, %61 : vector<8x32xf32>
    %cst_32 = arith.constant dense<0.000000e+00> : vector<8xf32>
    %87 = vector.multi_reduction <add>, %86, %cst_32 [1] : vector<8x32xf32> to vector<8xf32>
    %88 = vector.shape_cast %87 : vector<8xf32> to vector<8x1xf32>
    %cst_33 = arith.constant 9.99999996E-13 : f32
    %89 = vector.broadcast %cst_33 : f32 to vector<8x1xf32>
    %90 = arith.addf %88, %89 : vector<8x1xf32>
    %91 = math.rsqrt %90 : vector<8x1xf32>
    %92 = vector.broadcast %91 : vector<8x1xf32> to vector<8x32xf32>
    %93 = arith.mulf %61, %92 : vector<8x32xf32>
    %94 = tpu.concatenate %69, %77, %85, %93 in 0 : vector<8x32xf32>, vector<8x32xf32>, vector<8x32xf32>, vector<8x32xf32> -> vector<32x32xf32>
    %cst_34 = arith.constant dense<0.000000e+00> : vector<32x32xf32>
    %95 = tpu.matmul %94, %94, %cst_34 {dimension_numbers = #tpu.dot_dimension_numbers<[1], [1], [0], [0], [0, 0, 1, 0], [], []>} : vector<32x32xf32>, vector<32x32xf32>, vector<32x32xf32> -> vector<32x32xf32>
    %cst_35 = arith.constant 14.2857141 : f32
    %96 = vector.broadcast %cst_35 : f32 to vector<32x32xf32>
    %97 = arith.mulf %95, %96 : vector<32x32xf32>
    %98 = tpu.iota {dimensions = array<i32: 0>} : vector<8x8xi32>
    %99 = tpu.iota {dimensions = array<i32: 1>} : vector<8x8xi32>
    %100 = arith.cmpi eq, %98, %99 : vector<8x8xi32>
    %101 = arith.extui %100 : vector<8x8xi1> to vector<8x8xi32>
    %102 = arith.sitofp %101 : vector<8x8xi32> to vector<8x8xf32>
    %c2_i32 = arith.constant 2 : i32
    %103 = vector.broadcast %c2_i32 : i32 to vector<8x8xi32>
    %104 = arith.cmpi slt, %99, %103 : vector<8x8xi32>
    %c2_i32_36 = arith.constant 2 : i32
    %105 = vector.broadcast %c2_i32_36 : i32 to vector<8x8xi32>
    %106 = arith.cmpi slt, %98, %105 : vector<8x8xi32>
    %107 = tpu.iota {dimensions = array<i32: 0>} : vector<8x1xi32>
    %c2_i32_37 = arith.constant 2 : i32
    %108 = vector.broadcast %c2_i32_37 : i32 to vector<8x1xi32>
    %109 = arith.cmpi slt, %107, %108 : vector<8x1xi32>
    %110 = arith.extui %109 : vector<8x1xi1> to vector<8x1xi32>
    %111 = arith.sitofp %110 : vector<8x1xi32> to vector<8x1xf32>
    %112 = tpu.iota {dimensions = array<i32: 1>} : vector<1x8xi32>
    %c2_i32_38 = arith.constant 2 : i32
    %113 = vector.broadcast %c2_i32_38 : i32 to vector<1x8xi32>
    %114 = arith.cmpi slt, %112, %113 : vector<1x8xi32>
    %115 = arith.extui %114 : vector<1x8xi1> to vector<1x8xi32>
    %116 = arith.sitofp %115 : vector<1x8xi32> to vector<1x8xf32>
    %117 = vector.extract_strided_slice %97 {offsets = [0, 8], sizes = [8, 8], strides = [1, 1]} : vector<32x32xf32> to vector<8x8xf32>
    %cst_39 = arith.constant -1.000000e+30 : f32
    %118 = vector.broadcast %cst_39 : f32 to vector<8x8xf32>
    %119 = arith.select %104, %117, %118 : vector<8x8xi1>, vector<8x8xf32>
    %cst_40 = arith.constant dense<0xFF800000> : vector<8xf32>
    %120 = vector.multi_reduction <maximumf>, %119, %cst_40 [1] : vector<8x8xf32> to vector<8xf32>
    %121 = vector.shape_cast %120 : vector<8xf32> to vector<8x1xf32>
    %122 = vector.broadcast %121 : vector<8x1xf32> to vector<8x8xf32>
    %123 = arith.subf %119, %122 : vector<8x8xf32>
    %124 = math.exp %123 : vector<8x8xf32>
    %cst_41 = arith.constant dense<0.000000e+00> : vector<8xf32>
    %125 = vector.multi_reduction <add>, %124, %cst_41 [1] : vector<8x8xf32> to vector<8xf32>
    %126 = vector.shape_cast %125 : vector<8xf32> to vector<8x1xf32>
    %127 = math.log %126 : vector<8x1xf32>
    %128 = arith.addf %121, %127 : vector<8x1xf32>
    %129 = arith.mulf %119, %102 : vector<8x8xf32>
    %cst_42 = arith.constant dense<0.000000e+00> : vector<8xf32>
    %130 = vector.multi_reduction <add>, %129, %cst_42 [1] : vector<8x8xf32> to vector<8xf32>
    %131 = vector.shape_cast %130 : vector<8xf32> to vector<8x1xf32>
    %132 = arith.subf %128, %131 : vector<8x1xf32>
    %133 = arith.mulf %132, %111 : vector<8x1xf32>
    %134 = vector.shape_cast %133 : vector<8x1xf32> to vector<1x8x1xf32>
    %cst_43 = arith.constant dense<0.000000e+00> : vector<1xf32>
    %135 = vector.multi_reduction <add>, %134, %cst_43 [1, 2] : vector<1x8x1xf32> to vector<1xf32>
    %136 = vector.shape_cast %135 : vector<1xf32> to vector<1x1x1xf32>
    %137 = vector.extract %136[0, 0, 0] : f32 from vector<1x1x1xf32>
    %cst_44 = arith.constant 5.000000e-01 : f32
    %138 = arith.mulf %137, %cst_44 : f32
    %cst_45 = arith.constant 5.000000e-01 : f32
    %139 = arith.mulf %cst_45, %138 : f32
    %cst_46 = arith.constant 0.000000e+00 : f32
    %140 = arith.addf %cst_46, %139 : f32
    %cst_47 = arith.constant -1.000000e+30 : f32
    %141 = vector.broadcast %cst_47 : f32 to vector<8x8xf32>
    %142 = arith.select %106, %117, %141 : vector<8x8xi1>, vector<8x8xf32>
    %cst_48 = arith.constant dense<0xFF800000> : vector<8xf32>
    %143 = vector.multi_reduction <maximumf>, %142, %cst_48 [0] : vector<8x8xf32> to vector<8xf32>
    %144 = vector.shape_cast %143 : vector<8xf32> to vector<1x8xf32>
    %145 = vector.broadcast %144 : vector<1x8xf32> to vector<8x8xf32>
    %146 = arith.subf %142, %145 : vector<8x8xf32>
    %147 = math.exp %146 : vector<8x8xf32>
    %cst_49 = arith.constant dense<0.000000e+00> : vector<8xf32>
    %148 = vector.multi_reduction <add>, %147, %cst_49 [0] : vector<8x8xf32> to vector<8xf32>
    %149 = vector.shape_cast %148 : vector<8xf32> to vector<1x8xf32>
    %150 = math.log %149 : vector<1x8xf32>
    %151 = arith.addf %144, %150 : vector<1x8xf32>
    %152 = arith.mulf %142, %102 : vector<8x8xf32>
    %cst_50 = arith.constant dense<0.000000e+00> : vector<8xf32>
    %153 = vector.multi_reduction <add>, %152, %cst_50 [0] : vector<8x8xf32> to vector<8xf32>
    %154 = vector.shape_cast %153 : vector<8xf32> to vector<1x8xf32>
    %155 = arith.subf %151, %154 : vector<1x8xf32>
    %156 = arith.mulf %155, %116 : vector<1x8xf32>
    %157 = vector.shape_cast %156 : vector<1x8xf32> to vector<1x1x8xf32>
    %cst_51 = arith.constant dense<0.000000e+00> : vector<1xf32>
    %158 = vector.multi_reduction <add>, %157, %cst_51 [1, 2] : vector<1x1x8xf32> to vector<1xf32>
    %159 = vector.shape_cast %158 : vector<1xf32> to vector<1x1x1xf32>
    %160 = vector.extract %159[0, 0, 0] : f32 from vector<1x1x1xf32>
    %cst_52 = arith.constant 5.000000e-01 : f32
    %161 = arith.mulf %160, %cst_52 : f32
    %cst_53 = arith.constant 5.000000e-01 : f32
    %162 = arith.mulf %cst_53, %161 : f32
    %163 = arith.addf %140, %162 : f32
    %164 = vector.extract_strided_slice %97 {offsets = [0, 16], sizes = [8, 8], strides = [1, 1]} : vector<32x32xf32> to vector<8x8xf32>
    %cst_54 = arith.constant -1.000000e+30 : f32
    %165 = vector.broadcast %cst_54 : f32 to vector<8x8xf32>
    %166 = arith.select %104, %164, %165 : vector<8x8xi1>, vector<8x8xf32>
    %cst_55 = arith.constant dense<0xFF800000> : vector<8xf32>
    %167 = vector.multi_reduction <maximumf>, %166, %cst_55 [1] : vector<8x8xf32> to vector<8xf32>
    %168 = vector.shape_cast %167 : vector<8xf32> to vector<8x1xf32>
    %169 = vector.broadcast %168 : vector<8x1xf32> to vector<8x8xf32>
    %170 = arith.subf %166, %169 : vector<8x8xf32>
    %171 = math.exp %170 : vector<8x8xf32>
    %cst_56 = arith.constant dense<0.000000e+00> : vector<8xf32>
    %172 = vector.multi_reduction <add>, %171, %cst_56 [1] : vector<8x8xf32> to vector<8xf32>
    %173 = vector.shape_cast %172 : vector<8xf32> to vector<8x1xf32>
    %174 = math.log %173 : vector<8x1xf32>
    %175 = arith.addf %168, %174 : vector<8x1xf32>
    %176 = arith.mulf %166, %102 : vector<8x8xf32>
    %cst_57 = arith.constant dense<0.000000e+00> : vector<8xf32>
    %177 = vector.multi_reduction <add>, %176, %cst_57 [1] : vector<8x8xf32> to vector<8xf32>
    %178 = vector.shape_cast %177 : vector<8xf32> to vector<8x1xf32>
    %179 = arith.subf %175, %178 : vector<8x1xf32>
    %180 = arith.mulf %179, %111 : vector<8x1xf32>
    %181 = vector.shape_cast %180 : vector<8x1xf32> to vector<1x8x1xf32>
    %cst_58 = arith.constant dense<0.000000e+00> : vector<1xf32>
    %182 = vector.multi_reduction <add>, %181, %cst_58 [1, 2] : vector<1x8x1xf32> to vector<1xf32>
    %183 = vector.shape_cast %182 : vector<1xf32> to vector<1x1x1xf32>
    %184 = vector.extract %183[0, 0, 0] : f32 from vector<1x1x1xf32>
    %cst_59 = arith.constant 5.000000e-01 : f32
    %185 = arith.mulf %184, %cst_59 : f32
    %cst_60 = arith.constant 5.000000e-01 : f32
    %186 = arith.mulf %cst_60, %185 : f32
    %187 = arith.addf %163, %186 : f32
    %cst_61 = arith.constant -1.000000e+30 : f32
    %188 = vector.broadcast %cst_61 : f32 to vector<8x8xf32>
    %189 = arith.select %106, %164, %188 : vector<8x8xi1>, vector<8x8xf32>
    %cst_62 = arith.constant dense<0xFF800000> : vector<8xf32>
    %190 = vector.multi_reduction <maximumf>, %189, %cst_62 [0] : vector<8x8xf32> to vector<8xf32>
    %191 = vector.shape_cast %190 : vector<8xf32> to vector<1x8xf32>
    %192 = vector.broadcast %191 : vector<1x8xf32> to vector<8x8xf32>
    %193 = arith.subf %189, %192 : vector<8x8xf32>
    %194 = math.exp %193 : vector<8x8xf32>
    %cst_63 = arith.constant dense<0.000000e+00> : vector<8xf32>
    %195 = vector.multi_reduction <add>, %194, %cst_63 [0] : vector<8x8xf32> to vector<8xf32>
    %196 = vector.shape_cast %195 : vector<8xf32> to vector<1x8xf32>
    %197 = math.log %196 : vector<1x8xf32>
    %198 = arith.addf %191, %197 : vector<1x8xf32>
    %199 = arith.mulf %189, %102 : vector<8x8xf32>
    %cst_64 = arith.constant dense<0.000000e+00> : vector<8xf32>
    %200 = vector.multi_reduction <add>, %199, %cst_64 [0] : vector<8x8xf32> to vector<8xf32>
    %201 = vector.shape_cast %200 : vector<8xf32> to vector<1x8xf32>
    %202 = arith.subf %198, %201 : vector<1x8xf32>
    %203 = arith.mulf %202, %116 : vector<1x8xf32>
    %204 = vector.shape_cast %203 : vector<1x8xf32> to vector<1x1x8xf32>
    %cst_65 = arith.constant dense<0.000000e+00> : vector<1xf32>
    %205 = vector.multi_reduction <add>, %204, %cst_65 [1, 2] : vector<1x1x8xf32> to vector<1xf32>
    %206 = vector.shape_cast %205 : vector<1xf32> to vector<1x1x1xf32>
    %207 = vector.extract %206[0, 0, 0] : f32 from vector<1x1x1xf32>
    %cst_66 = arith.constant 5.000000e-01 : f32
    %208 = arith.mulf %207, %cst_66 : f32
    %cst_67 = arith.constant 5.000000e-01 : f32
    %209 = arith.mulf %cst_67, %208 : f32
    %210 = arith.addf %187, %209 : f32
    %211 = vector.extract_strided_slice %97 {offsets = [0, 24], sizes = [8, 8], strides = [1, 1]} : vector<32x32xf32> to vector<8x8xf32>
    %cst_68 = arith.constant -1.000000e+30 : f32
    %212 = vector.broadcast %cst_68 : f32 to vector<8x8xf32>
    %213 = arith.select %104, %211, %212 : vector<8x8xi1>, vector<8x8xf32>
    %cst_69 = arith.constant dense<0xFF800000> : vector<8xf32>
    %214 = vector.multi_reduction <maximumf>, %213, %cst_69 [1] : vector<8x8xf32> to vector<8xf32>
    %215 = vector.shape_cast %214 : vector<8xf32> to vector<8x1xf32>
    %216 = vector.broadcast %215 : vector<8x1xf32> to vector<8x8xf32>
    %217 = arith.subf %213, %216 : vector<8x8xf32>
    %218 = math.exp %217 : vector<8x8xf32>
    %cst_70 = arith.constant dense<0.000000e+00> : vector<8xf32>
    %219 = vector.multi_reduction <add>, %218, %cst_70 [1] : vector<8x8xf32> to vector<8xf32>
    %220 = vector.shape_cast %219 : vector<8xf32> to vector<8x1xf32>
    %221 = math.log %220 : vector<8x1xf32>
    %222 = arith.addf %215, %221 : vector<8x1xf32>
    %223 = arith.mulf %213, %102 : vector<8x8xf32>
    %cst_71 = arith.constant dense<0.000000e+00> : vector<8xf32>
    %224 = vector.multi_reduction <add>, %223, %cst_71 [1] : vector<8x8xf32> to vector<8xf32>
    %225 = vector.shape_cast %224 : vector<8xf32> to vector<8x1xf32>
    %226 = arith.subf %222, %225 : vector<8x1xf32>
    %227 = arith.mulf %226, %111 : vector<8x1xf32>
    %228 = vector.shape_cast %227 : vector<8x1xf32> to vector<1x8x1xf32>
    %cst_72 = arith.constant dense<0.000000e+00> : vector<1xf32>
    %229 = vector.multi_reduction <add>, %228, %cst_72 [1, 2] : vector<1x8x1xf32> to vector<1xf32>
    %230 = vector.shape_cast %229 : vector<1xf32> to vector<1x1x1xf32>
    %231 = vector.extract %230[0, 0, 0] : f32 from vector<1x1x1xf32>
    %cst_73 = arith.constant 5.000000e-01 : f32
    %232 = arith.mulf %231, %cst_73 : f32
    %cst_74 = arith.constant 5.000000e-01 : f32
    %233 = arith.mulf %cst_74, %232 : f32
    %234 = arith.addf %210, %233 : f32
    %cst_75 = arith.constant -1.000000e+30 : f32
    %235 = vector.broadcast %cst_75 : f32 to vector<8x8xf32>
    %236 = arith.select %106, %211, %235 : vector<8x8xi1>, vector<8x8xf32>
    %cst_76 = arith.constant dense<0xFF800000> : vector<8xf32>
    %237 = vector.multi_reduction <maximumf>, %236, %cst_76 [0] : vector<8x8xf32> to vector<8xf32>
    %238 = vector.shape_cast %237 : vector<8xf32> to vector<1x8xf32>
    %239 = vector.broadcast %238 : vector<1x8xf32> to vector<8x8xf32>
    %240 = arith.subf %236, %239 : vector<8x8xf32>
    %241 = math.exp %240 : vector<8x8xf32>
    %cst_77 = arith.constant dense<0.000000e+00> : vector<8xf32>
    %242 = vector.multi_reduction <add>, %241, %cst_77 [0] : vector<8x8xf32> to vector<8xf32>
    %243 = vector.shape_cast %242 : vector<8xf32> to vector<1x8xf32>
    %244 = math.log %243 : vector<1x8xf32>
    %245 = arith.addf %238, %244 : vector<1x8xf32>
    %246 = arith.mulf %236, %102 : vector<8x8xf32>
    %cst_78 = arith.constant dense<0.000000e+00> : vector<8xf32>
    %247 = vector.multi_reduction <add>, %246, %cst_78 [0] : vector<8x8xf32> to vector<8xf32>
    %248 = vector.shape_cast %247 : vector<8xf32> to vector<1x8xf32>
    %249 = arith.subf %245, %248 : vector<1x8xf32>
    %250 = arith.mulf %249, %116 : vector<1x8xf32>
    %251 = vector.shape_cast %250 : vector<1x8xf32> to vector<1x1x8xf32>
    %cst_79 = arith.constant dense<0.000000e+00> : vector<1xf32>
    %252 = vector.multi_reduction <add>, %251, %cst_79 [1, 2] : vector<1x1x8xf32> to vector<1xf32>
    %253 = vector.shape_cast %252 : vector<1xf32> to vector<1x1x1xf32>
    %254 = vector.extract %253[0, 0, 0] : f32 from vector<1x1x1xf32>
    %cst_80 = arith.constant 5.000000e-01 : f32
    %255 = arith.mulf %254, %cst_80 : f32
    %cst_81 = arith.constant 5.000000e-01 : f32
    %256 = arith.mulf %cst_81, %255 : f32
    %257 = arith.addf %234, %256 : f32
    %258 = vector.extract_strided_slice %97 {offsets = [8, 16], sizes = [8, 8], strides = [1, 1]} : vector<32x32xf32> to vector<8x8xf32>
    %cst_82 = arith.constant -1.000000e+30 : f32
    %259 = vector.broadcast %cst_82 : f32 to vector<8x8xf32>
    %260 = arith.select %104, %258, %259 : vector<8x8xi1>, vector<8x8xf32>
    %cst_83 = arith.constant dense<0xFF800000> : vector<8xf32>
    %261 = vector.multi_reduction <maximumf>, %260, %cst_83 [1] : vector<8x8xf32> to vector<8xf32>
    %262 = vector.shape_cast %261 : vector<8xf32> to vector<8x1xf32>
    %263 = vector.broadcast %262 : vector<8x1xf32> to vector<8x8xf32>
    %264 = arith.subf %260, %263 : vector<8x8xf32>
    %265 = math.exp %264 : vector<8x8xf32>
    %cst_84 = arith.constant dense<0.000000e+00> : vector<8xf32>
    %266 = vector.multi_reduction <add>, %265, %cst_84 [1] : vector<8x8xf32> to vector<8xf32>
    %267 = vector.shape_cast %266 : vector<8xf32> to vector<8x1xf32>
    %268 = math.log %267 : vector<8x1xf32>
    %269 = arith.addf %262, %268 : vector<8x1xf32>
    %270 = arith.mulf %260, %102 : vector<8x8xf32>
    %cst_85 = arith.constant dense<0.000000e+00> : vector<8xf32>
    %271 = vector.multi_reduction <add>, %270, %cst_85 [1] : vector<8x8xf32> to vector<8xf32>
    %272 = vector.shape_cast %271 : vector<8xf32> to vector<8x1xf32>
    %273 = arith.subf %269, %272 : vector<8x1xf32>
    %274 = arith.mulf %273, %111 : vector<8x1xf32>
    %275 = vector.shape_cast %274 : vector<8x1xf32> to vector<1x8x1xf32>
    %cst_86 = arith.constant dense<0.000000e+00> : vector<1xf32>
    %276 = vector.multi_reduction <add>, %275, %cst_86 [1, 2] : vector<1x8x1xf32> to vector<1xf32>
    %277 = vector.shape_cast %276 : vector<1xf32> to vector<1x1x1xf32>
    %278 = vector.extract %277[0, 0, 0] : f32 from vector<1x1x1xf32>
    %cst_87 = arith.constant 5.000000e-01 : f32
    %279 = arith.mulf %278, %cst_87 : f32
    %cst_88 = arith.constant 5.000000e-01 : f32
    %280 = arith.mulf %cst_88, %279 : f32
    %281 = arith.addf %257, %280 : f32
    %cst_89 = arith.constant -1.000000e+30 : f32
    %282 = vector.broadcast %cst_89 : f32 to vector<8x8xf32>
    %283 = arith.select %106, %258, %282 : vector<8x8xi1>, vector<8x8xf32>
    %cst_90 = arith.constant dense<0xFF800000> : vector<8xf32>
    %284 = vector.multi_reduction <maximumf>, %283, %cst_90 [0] : vector<8x8xf32> to vector<8xf32>
    %285 = vector.shape_cast %284 : vector<8xf32> to vector<1x8xf32>
    %286 = vector.broadcast %285 : vector<1x8xf32> to vector<8x8xf32>
    %287 = arith.subf %283, %286 : vector<8x8xf32>
    %288 = math.exp %287 : vector<8x8xf32>
    %cst_91 = arith.constant dense<0.000000e+00> : vector<8xf32>
    %289 = vector.multi_reduction <add>, %288, %cst_91 [0] : vector<8x8xf32> to vector<8xf32>
    %290 = vector.shape_cast %289 : vector<8xf32> to vector<1x8xf32>
    %291 = math.log %290 : vector<1x8xf32>
    %292 = arith.addf %285, %291 : vector<1x8xf32>
    %293 = arith.mulf %283, %102 : vector<8x8xf32>
    %cst_92 = arith.constant dense<0.000000e+00> : vector<8xf32>
    %294 = vector.multi_reduction <add>, %293, %cst_92 [0] : vector<8x8xf32> to vector<8xf32>
    %295 = vector.shape_cast %294 : vector<8xf32> to vector<1x8xf32>
    %296 = arith.subf %292, %295 : vector<1x8xf32>
    %297 = arith.mulf %296, %116 : vector<1x8xf32>
    %298 = vector.shape_cast %297 : vector<1x8xf32> to vector<1x1x8xf32>
    %cst_93 = arith.constant dense<0.000000e+00> : vector<1xf32>
    %299 = vector.multi_reduction <add>, %298, %cst_93 [1, 2] : vector<1x1x8xf32> to vector<1xf32>
    %300 = vector.shape_cast %299 : vector<1xf32> to vector<1x1x1xf32>
    %301 = vector.extract %300[0, 0, 0] : f32 from vector<1x1x1xf32>
    %cst_94 = arith.constant 5.000000e-01 : f32
    %302 = arith.mulf %301, %cst_94 : f32
    %cst_95 = arith.constant 5.000000e-01 : f32
    %303 = arith.mulf %cst_95, %302 : f32
    %304 = arith.addf %281, %303 : f32
    %305 = vector.extract_strided_slice %97 {offsets = [8, 24], sizes = [8, 8], strides = [1, 1]} : vector<32x32xf32> to vector<8x8xf32>
    %cst_96 = arith.constant -1.000000e+30 : f32
    %306 = vector.broadcast %cst_96 : f32 to vector<8x8xf32>
    %307 = arith.select %104, %305, %306 : vector<8x8xi1>, vector<8x8xf32>
    %cst_97 = arith.constant dense<0xFF800000> : vector<8xf32>
    %308 = vector.multi_reduction <maximumf>, %307, %cst_97 [1] : vector<8x8xf32> to vector<8xf32>
    %309 = vector.shape_cast %308 : vector<8xf32> to vector<8x1xf32>
    %310 = vector.broadcast %309 : vector<8x1xf32> to vector<8x8xf32>
    %311 = arith.subf %307, %310 : vector<8x8xf32>
    %312 = math.exp %311 : vector<8x8xf32>
    %cst_98 = arith.constant dense<0.000000e+00> : vector<8xf32>
    %313 = vector.multi_reduction <add>, %312, %cst_98 [1] : vector<8x8xf32> to vector<8xf32>
    %314 = vector.shape_cast %313 : vector<8xf32> to vector<8x1xf32>
    %315 = math.log %314 : vector<8x1xf32>
    %316 = arith.addf %309, %315 : vector<8x1xf32>
    %317 = arith.mulf %307, %102 : vector<8x8xf32>
    %cst_99 = arith.constant dense<0.000000e+00> : vector<8xf32>
    %318 = vector.multi_reduction <add>, %317, %cst_99 [1] : vector<8x8xf32> to vector<8xf32>
    %319 = vector.shape_cast %318 : vector<8xf32> to vector<8x1xf32>
    %320 = arith.subf %316, %319 : vector<8x1xf32>
    %321 = arith.mulf %320, %111 : vector<8x1xf32>
    %322 = vector.shape_cast %321 : vector<8x1xf32> to vector<1x8x1xf32>
    %cst_100 = arith.constant dense<0.000000e+00> : vector<1xf32>
    %323 = vector.multi_reduction <add>, %322, %cst_100 [1, 2] : vector<1x8x1xf32> to vector<1xf32>
    %324 = vector.shape_cast %323 : vector<1xf32> to vector<1x1x1xf32>
    %325 = vector.extract %324[0, 0, 0] : f32 from vector<1x1x1xf32>
    %cst_101 = arith.constant 5.000000e-01 : f32
    %326 = arith.mulf %325, %cst_101 : f32
    %cst_102 = arith.constant 5.000000e-01 : f32
    %327 = arith.mulf %cst_102, %326 : f32
    %328 = arith.addf %304, %327 : f32
    %cst_103 = arith.constant -1.000000e+30 : f32
    %329 = vector.broadcast %cst_103 : f32 to vector<8x8xf32>
    %330 = arith.select %106, %305, %329 : vector<8x8xi1>, vector<8x8xf32>
    %cst_104 = arith.constant dense<0xFF800000> : vector<8xf32>
    %331 = vector.multi_reduction <maximumf>, %330, %cst_104 [0] : vector<8x8xf32> to vector<8xf32>
    %332 = vector.shape_cast %331 : vector<8xf32> to vector<1x8xf32>
    %333 = vector.broadcast %332 : vector<1x8xf32> to vector<8x8xf32>
    %334 = arith.subf %330, %333 : vector<8x8xf32>
    %335 = math.exp %334 : vector<8x8xf32>
    %cst_105 = arith.constant dense<0.000000e+00> : vector<8xf32>
    %336 = vector.multi_reduction <add>, %335, %cst_105 [0] : vector<8x8xf32> to vector<8xf32>
    %337 = vector.shape_cast %336 : vector<8xf32> to vector<1x8xf32>
    %338 = math.log %337 : vector<1x8xf32>
    %339 = arith.addf %332, %338 : vector<1x8xf32>
    %340 = arith.mulf %330, %102 : vector<8x8xf32>
    %cst_106 = arith.constant dense<0.000000e+00> : vector<8xf32>
    %341 = vector.multi_reduction <add>, %340, %cst_106 [0] : vector<8x8xf32> to vector<8xf32>
    %342 = vector.shape_cast %341 : vector<8xf32> to vector<1x8xf32>
    %343 = arith.subf %339, %342 : vector<1x8xf32>
    %344 = arith.mulf %343, %116 : vector<1x8xf32>
    %345 = vector.shape_cast %344 : vector<1x8xf32> to vector<1x1x8xf32>
    %cst_107 = arith.constant dense<0.000000e+00> : vector<1xf32>
    %346 = vector.multi_reduction <add>, %345, %cst_107 [1, 2] : vector<1x1x8xf32> to vector<1xf32>
    %347 = vector.shape_cast %346 : vector<1xf32> to vector<1x1x1xf32>
    %348 = vector.extract %347[0, 0, 0] : f32 from vector<1x1x1xf32>
    %cst_108 = arith.constant 5.000000e-01 : f32
    %349 = arith.mulf %348, %cst_108 : f32
    %cst_109 = arith.constant 5.000000e-01 : f32
    %350 = arith.mulf %cst_109, %349 : f32
    %351 = arith.addf %328, %350 : f32
    %352 = vector.extract_strided_slice %97 {offsets = [16, 24], sizes = [8, 8], strides = [1, 1]} : vector<32x32xf32> to vector<8x8xf32>
    %cst_110 = arith.constant -1.000000e+30 : f32
    %353 = vector.broadcast %cst_110 : f32 to vector<8x8xf32>
    %354 = arith.select %104, %352, %353 : vector<8x8xi1>, vector<8x8xf32>
    %cst_111 = arith.constant dense<0xFF800000> : vector<8xf32>
    %355 = vector.multi_reduction <maximumf>, %354, %cst_111 [1] : vector<8x8xf32> to vector<8xf32>
    %356 = vector.shape_cast %355 : vector<8xf32> to vector<8x1xf32>
    %357 = vector.broadcast %356 : vector<8x1xf32> to vector<8x8xf32>
    %358 = arith.subf %354, %357 : vector<8x8xf32>
    %359 = math.exp %358 : vector<8x8xf32>
    %cst_112 = arith.constant dense<0.000000e+00> : vector<8xf32>
    %360 = vector.multi_reduction <add>, %359, %cst_112 [1] : vector<8x8xf32> to vector<8xf32>
    %361 = vector.shape_cast %360 : vector<8xf32> to vector<8x1xf32>
    %362 = math.log %361 : vector<8x1xf32>
    %363 = arith.addf %356, %362 : vector<8x1xf32>
    %364 = arith.mulf %354, %102 : vector<8x8xf32>
    %cst_113 = arith.constant dense<0.000000e+00> : vector<8xf32>
    %365 = vector.multi_reduction <add>, %364, %cst_113 [1] : vector<8x8xf32> to vector<8xf32>
    %366 = vector.shape_cast %365 : vector<8xf32> to vector<8x1xf32>
    %367 = arith.subf %363, %366 : vector<8x1xf32>
    %368 = arith.mulf %367, %111 : vector<8x1xf32>
    %369 = vector.shape_cast %368 : vector<8x1xf32> to vector<1x8x1xf32>
    %cst_114 = arith.constant dense<0.000000e+00> : vector<1xf32>
    %370 = vector.multi_reduction <add>, %369, %cst_114 [1, 2] : vector<1x8x1xf32> to vector<1xf32>
    %371 = vector.shape_cast %370 : vector<1xf32> to vector<1x1x1xf32>
    %372 = vector.extract %371[0, 0, 0] : f32 from vector<1x1x1xf32>
    %cst_115 = arith.constant 5.000000e-01 : f32
    %373 = arith.mulf %372, %cst_115 : f32
    %cst_116 = arith.constant 5.000000e-01 : f32
    %374 = arith.mulf %cst_116, %373 : f32
    %375 = arith.addf %351, %374 : f32
    %cst_117 = arith.constant -1.000000e+30 : f32
    %376 = vector.broadcast %cst_117 : f32 to vector<8x8xf32>
    %377 = arith.select %106, %352, %376 : vector<8x8xi1>, vector<8x8xf32>
    %cst_118 = arith.constant dense<0xFF800000> : vector<8xf32>
    %378 = vector.multi_reduction <maximumf>, %377, %cst_118 [0] : vector<8x8xf32> to vector<8xf32>
    %379 = vector.shape_cast %378 : vector<8xf32> to vector<1x8xf32>
    %380 = vector.broadcast %379 : vector<1x8xf32> to vector<8x8xf32>
    %381 = arith.subf %377, %380 : vector<8x8xf32>
    %382 = math.exp %381 : vector<8x8xf32>
    %cst_119 = arith.constant dense<0.000000e+00> : vector<8xf32>
    %383 = vector.multi_reduction <add>, %382, %cst_119 [0] : vector<8x8xf32> to vector<8xf32>
    %384 = vector.shape_cast %383 : vector<8xf32> to vector<1x8xf32>
    %385 = math.log %384 : vector<1x8xf32>
    %386 = arith.addf %379, %385 : vector<1x8xf32>
    %387 = arith.mulf %377, %102 : vector<8x8xf32>
    %cst_120 = arith.constant dense<0.000000e+00> : vector<8xf32>
    %388 = vector.multi_reduction <add>, %387, %cst_120 [0] : vector<8x8xf32> to vector<8xf32>
    %389 = vector.shape_cast %388 : vector<8xf32> to vector<1x8xf32>
    %390 = arith.subf %386, %389 : vector<1x8xf32>
    %391 = arith.mulf %390, %116 : vector<1x8xf32>
    %392 = vector.shape_cast %391 : vector<1x8xf32> to vector<1x1x8xf32>
    %cst_121 = arith.constant dense<0.000000e+00> : vector<1xf32>
    %393 = vector.multi_reduction <add>, %392, %cst_121 [1, 2] : vector<1x1x8xf32> to vector<1xf32>
    %394 = vector.shape_cast %393 : vector<1xf32> to vector<1x1x1xf32>
    %395 = vector.extract %394[0, 0, 0] : f32 from vector<1x1x1xf32>
    %cst_122 = arith.constant 5.000000e-01 : f32
    %396 = arith.mulf %395, %cst_122 : f32
    %cst_123 = arith.constant 5.000000e-01 : f32
    %397 = arith.mulf %cst_123, %396 : f32
    %398 = arith.addf %375, %397 : f32
    %cst_124 = arith.constant 1.000000e+00 : f32
    %399 = vector.broadcast %cst_124 : f32 to vector<1x128xf32>
    %400 = vector.broadcast %398 : f32 to vector<1x128xf32>
    %401 = arith.mulf %400, %399 : vector<1x128xf32>
    %c0_125 = arith.constant 0 : index
    %c0_126 = arith.constant 0 : index
    %402 = vector.load %arg10[%c0_125, %c0_126] : memref<1x128xf32, #tpu.memory_space<vmem>>, vector<1x128xf32>
    tpu.vector_store %arg10[%c0_125, %c0_126], %401 {strides = array<i32>} : memref<1x128xf32, #tpu.memory_space<vmem>>, vector<1x128xf32>,
    return
  }
  func.func @transform_0(%arg0: i32) -> (i32, i32) {
    %c0_i32 = arith.constant 0 : i32
    %c0_i32_0 = arith.constant 0 : i32
    %c0_i32_1 = arith.constant 0 : i32
    return %c0_i32, %c0_i32_0 : i32, i32
  }
  func.func @transform_1(%arg0: i32) -> (i32, i32) {
    %c0_i32 = arith.constant 0 : i32
    %c0_i32_0 = arith.constant 0 : i32
    %c0_i32_1 = arith.constant 0 : i32
    return %c0_i32, %c0_i32_0 : i32, i32
  }
  func.func @transform_2(%arg0: i32) -> (i32, i32) {
    %c0_i32 = arith.constant 0 : i32
    %c0_i32_0 = arith.constant 0 : i32
    %c0_i32_1 = arith.constant 0 : i32
    return %c0_i32, %c0_i32_0 : i32, i32
  }
  func.func @transform_3(%arg0: i32) -> (i32, i32) {
    %c0_i32 = arith.constant 0 : i32
    %c0_i32_0 = arith.constant 0 : i32
    %c0_i32_1 = arith.constant 0 : i32
    return %c0_i32, %c0_i32_0 : i32, i32
  }
  func.func @transform_4(%arg0: i32) -> (i32, i32) {
    %c0_i32 = arith.constant 0 : i32
    %c0_i32_0 = arith.constant 0 : i32
    %c0_i32_1 = arith.constant 0 : i32
    return %c0_i32, %c0_i32_0 : i32, i32
  }
  func.func @transform_5(%arg0: i32) -> (i32, i32) {
    %c0_i32 = arith.constant 0 : i32
    %c0_i32_0 = arith.constant 0 : i32
    %c0_i32_1 = arith.constant 0 : i32
    return %c0_i32, %c0_i32_0 : i32, i32
  }
  func.func @transform_6(%arg0: i32) -> (i32, i32) {
    %c0_i32 = arith.constant 0 : i32
    %c0_i32_0 = arith.constant 0 : i32
    %c0_i32_1 = arith.constant 0 : i32
    return %c0_i32, %c0_i32_0 : i32, i32
  }
  func.func @transform_7(%arg0: i32) -> (i32, i32) {
    %c0_i32 = arith.constant 0 : i32
    %c0_i32_0 = arith.constant 0 : i32
    %c0_i32_1 = arith.constant 0 : i32
    return %c0_i32, %c0_i32_0 : i32, i32
  }
  func.func @transform_8(%arg0: i32) -> (i32, i32) {
    %c0_i32 = arith.constant 0 : i32
    %c0_i32_0 = arith.constant 0 : i32
    %c0_i32_1 = arith.constant 0 : i32
    return %c0_i32, %c0_i32_0 : i32, i32
  }
  func.func @transform_9(%arg0: i32) -> (i32, i32) {
    %c0_i32 = arith.constant 0 : i32
    %c0_i32_0 = arith.constant 0 : i32
    %c0_i32_1 = arith.constant 0 : i32
    return %c0_i32, %c0_i32_0 : i32, i32
  }
}

</mosaic_0001>

<bundles_post_ra>
// kernel: _lambda_.1
= control target key start
LH: loop header
LB: loop body
LE: loop exit
PB: predicated region body
PF: predicated region fallthrough
CT: control target
= control target key end

     0   :  { %15 = vsyncpa [#allocation3], 0  ;;  %s3468_s0 = inlined_call_operand.vmem [shape: f32[8,768], index: 0, kind: input, shape index: {}]   ;;  %s3469_s1 = inlined_call_operand.vmem [shape: f32[8,1024], index: 1, kind: input, shape index: {}]   ;;  %s3470_s2 = inlined_call_operand.vmem [shape: f32[8,24], index: 2, kind: input, shape index: {}]   ;;  %s3471_s3 = inlined_call_operand.vmem [shape: f32[8,48], index: 3, kind: input, shape index: {}]   ;;  %s3472_s4 = inlined_call_operand.vmem [shape: bf16[768,32], index: 4, kind: input, shape index: {}]   ;;  %s3473_s5 = inlined_call_operand.hbm [shape: bf16[1024,32], index: 5, kind: input, shape index: {}]   ;;  %s3474_s6 = inlined_call_operand.hbm [shape: f32[168,160], index: 6, kind: input, shape index: {}]   ;;  %s3475_s7 = inlined_call_operand.vmem [shape: f32[8,160], index: 7, kind: input, shape index: {}]   ;;  %s3476_s8 = inlined_call_operand.vmem [shape: f32[8,128], index: 8, kind: output, shape index: {0}]   ;;  %s3477_s9 = inlined_call_operand.hbm [shape: f32[1,128], index: 9, kind: output, shape index: {1}]  }
   0x1   :  { %16 = vsyncpa [#allocation6], 0 }
   0x2   :  { %17 = vsyncpa [#allocation4], 0  ;;  %s2869_s30 = smov [#allocation2]   ;;  %s2797_s13 = scalar_lea.hbm %s3473_s5, 8192 }
   0x3   :  { %s33_s10 = sshll.u32 %s2869_s30, 4  ;;  %p2798_p0 = scmp.ne.s32.totalorder %s3473_s5, %s2797_s13  ;;  %s34_s10 = int_to_ptr.vmem [resolvable:$true] %s33_s10 }
   0x4   :  { %p2801_p1 = scmp.lt.u32.totalorder %s2797_s13, %s3473_s5 }
   0x6   :  { %p2803_p2 = pnand %p2801_p1, %p2798_p0 }
   0x8   :  { %2806 = shalt.err (!%p2803_p2)
}
   0x9   :  { %s2807_s18 = scalar_lea.vmem %s34_s10, 8192  ;;  %p2812_p4 = scmp.lt.s32.totalorder %s34_s10, %s34_s10 }
   0xa   :  { %p2808_p3 = scmp.ne.s32.totalorder %s34_s10, %s2807_s18  ;;  %p2813_p5 = scmp.lt.s32.totalorder %s2807_s18, %s2807_s18 }
   0xc   :  { %p2814_p6 = por %p2813_p5, %p2812_p4 }
   0xe   :  { %p2815_p7 = pnand %p2814_p6, %p2808_p3 }
  0x10   :  { %2818 = shalt.err (!%p2815_p7)
}
  0x11   :  { %s2870_s19 = smov 64   ;;  %s2871_s20 = smov 4  }
  0x12   :  { %39 = dma.hbm_to_vmem [thread:$0]  %s3473_s5, 8192, %s34_s10, [#allocation3], %s2870_s19, %s2870_s19, %s2871_s20  }
  0x13   :  { %s2872_s23 = smov [#allocation5]   ;;  %s2819_s27 = scalar_lea.hbm %s3474_s6, 5376 }
  0x14   :  { %s45_s24 = sshll.u32 %s2872_s23, 4  ;;  %p2820_p8 = scmp.ne.s32.totalorder %s3474_s6, %s2819_s27  ;;  %s46_s24 = int_to_ptr.vmem [resolvable:$true] %s45_s24 }
  0x15   :  { %p2823_p9 = scmp.lt.u32.totalorder %s2819_s27, %s3474_s6 }
  0x17   :  { %p2825_p10 = pnand %p2823_p9, %p2820_p8 }
  0x19   :  { %2828 = shalt.err (!%p2825_p10)
}
  0x1a   :  { %s2829_s12 = scalar_lea.vmem %s46_s24, 5376  ;;  %p2834_p12 = scmp.lt.s32.totalorder %s46_s24, %s46_s24 }
  0x1b   :  { %p2830_p11 = scmp.ne.s32.totalorder %s46_s24, %s2829_s12  ;;  %p2835_p13 = scmp.lt.s32.totalorder %s2829_s12, %s2829_s12 }
  0x1d   :  { %p2836_p0 = por %p2835_p13, %p2834_p12 }
  0x1f   :  { %p2837_p1 = pnand %p2836_p0, %p2830_p11 }
  0x21   :  { %2840 = shalt.err (!%p2837_p1)
}
  0x22   :  { %s2873_s5 = smov 256   ;;  %s2874_s10 = smov 16  }
  0x23   :  { %51 = dma.hbm_to_vmem [thread:$0]  %s3474_s6, 5376, %s46_s24, [#allocation6], %s2873_s5, %s2873_s5, %s2874_s10  }
  0x24   :  { %2863 = dma.done.wait [#allocation3], 8192  }
  0x25   :  { %2864 = vsyncadd [#allocation3], 4294959104 }
  0x26   :  { %2865 = dma.done.wait [#allocation6], 5376  }
  0x27   :  { %2866 = vsyncadd [#allocation6], 4294961920  ;;  %v2627_v0 = vld [vmem:[%s3472_s4 + $0x40] sm:$0xff]   ;;  %v2631_v4 = vld [vmem:[%s3472_s4 + $0x48] sm:$0xff]   ;;  %vm2877_vm0 = vmmov 0   ;;  %vm630_vm1 = vcmask 261120  }
  0x28   :  { %v2628_v1 = vld [vmem:[%s3472_s4] sm:$0xff]   ;;  %2343 = vmatprep.subr.bf16.mxu0 %v2627_v0  ;;  %v2632_v5 = vld [vmem:[%s3472_s4 + $0x8] sm:$0xff]   ;;  %v2635_v8 = vld [vmem:[%s3472_s4 + $0x50] sm:$0xff]   ;;  %vm1378_vm2 = vcmask 1043456   ;;  %vm1374_vm3 = vcmask 195584   ;;  %vm1486_vm4 = vcmask 392192  }
  0x29   :  { %v2629_v2 = vld [vmem:[%s3472_s4 + $0xc0] sm:$0xff]   ;;  %2344 = vmatpush3.bf16.msra.mxu0 %v2628_v1  ;;  %v2633_v6 = vld [vmem:[%s3472_s4 + $0xc8] sm:$0xff]   ;;  %v2636_v9 = vld [vmem:[%s3472_s4 + $0x10] sm:$0xff]   ;;  %vm1436_vm5 = vcmask 523264   ;;  %vm1675_vm8 = vcmask 64512   ;;  %vm1709_vm11 = vcmask 130112  }
  0x2a   :  { %v2630_v3 = vld [vmem:[%s3472_s4 + $0x80] sm:$0xff]   ;;  %2365 = vmatprep.subr.bf16.mxu1 %v2629_v2  ;;  %2345 = vmatprep.subr.bf16.mxu0 %v2631_v4  ;;  %v2634_v7 = vld [vmem:[%s3472_s4 + $0x88] sm:$0xff]   ;;  %v2637_v10 = vld [vmem:[%s3472_s4 + $0xd0] sm:$0xff]   ;;  %vm1801_vm12 = vcmask 195712   ;;  %vm1890_vm13 = vcmask 261312   ;;  %vm1752_vm14 = vcmask 57344  }
  0x2b   :  { %2366 = vmatpush3.bf16.msra.mxu1 %v2630_v3  ;;  %v2638_v11 = vld [vmem:[%s3472_s4 + $0x90] sm:$0xff]   ;;  %v2639_v12 = vld [vmem:[%s3472_s4 + $0x58] sm:$0xff]   ;;  %v2643_v16 = vld [vmem:[%s3472_s4 + $0x60] sm:$0xff]   ;;  %vm1694_vm15 = vcmask 7168  }
  0x2c   :  { %2367 = vmatprep.subr.bf16.mxu1 %v2633_v6  ;;  %v2640_v13 = vld [vmem:[%s3472_s4 + $0x18] sm:$0xff]   ;;  %v2644_v17 = vld [vmem:[%s3472_s4 + $0x20] sm:$0xff]   ;;  %v2647_v20 = vld [vmem:[%s3472_s4 + $0x68] sm:$0xff]  }
  0x2d   :  { %2346 = vmatpush3.bf16.msra.mxu0 %v2632_v5  ;;  %v2641_v14 = vld [vmem:[%s3472_s4 + $0xd8] sm:$0xff]   ;;  %v2645_v18 = vld [vmem:[%s3472_s4 + $0xe0] sm:$0xff]   ;;  %v2648_v21 = vld [vmem:[%s3472_s4 + $0x28] sm:$0xff]  }
  0x2e   :  { %2347 = vmatprep.subr.bf16.mxu0 %v2635_v8  ;;  %v2642_v15 = vld [vmem:[%s3472_s4 + $0x98] sm:$0xff]   ;;  %v2646_v19 = vld [vmem:[%s3472_s4 + $0xa0] sm:$0xff]   ;;  %v2649_v22 = vld [vmem:[%s3472_s4 + $0xe8] sm:$0xff]  }
  0x2f   :  { %2368 = vmatpush3.bf16.msra.mxu1 %v2634_v7  ;;  %v2650_v23 = vld [vmem:[%s3472_s4 + $0xa8] sm:$0xff]   ;;  %v2651_v24 = vld [vmem:[%s3472_s4 + $0x70] sm:$0xff]   ;;  %v2655_v28 = vld [vmem:[%s3472_s4 + $0x78] sm:$0xff]  }
  0x30   :  { %2369 = vmatprep.subr.bf16.mxu1 %v2637_v10  ;;  %v2652_v25 = vld [vmem:[%s3472_s4 + $0x30] sm:$0xff]   ;;  %v2656_v29 = vld [vmem:[%s3472_s4 + $0x38] sm:$0xff]   ;;  %v102_v31 = vld [vmem:[%s3468_s0 + $0x8] sm:$0xff] }
  0x31   :  { %2348 = vmatpush3.bf16.msra.mxu0 %v2636_v9  ;;  %v2653_v26 = vld [vmem:[%s3472_s4 + $0xf0] sm:$0xff]   ;;  %v2657_v30 = vld [vmem:[%s3472_s4 + $0xf8] sm:$0xff]   ;;  %v108_v32 = vpack.c.bf16 %v102_v31, %v102_v31  ;;  %v101_v34 = vld [vmem:[%s3468_s0] sm:$0xff]  ;;  %v2875_v9 = vmov 0  }
  0x32   :  { %2349 = vmatprep.subr.bf16.mxu0 %v2639_v12  ;;  %v2654_v27 = vld [vmem:[%s3472_s4 + $0xb0] sm:$0xff]   ;;  %v2658_v33 = vld [vmem:[%s3472_s4 + $0xb8] sm:$0xff]   ;;  %v107_v35 = vpack.c.bf16 %v101_v34, %v101_v34  ;;  %v2659_v36 = vld [vmem:[%s3472_s4 + $0x140] sm:$0xff]  }
  0x33   :  { %2370 = vmatpush3.bf16.msra.mxu1 %v2638_v11  ;;  %v104_v37 = vld [vmem:[%s3468_s0 + $0x18] sm:$0xff]  ;;  %533 = vmatprep.mubr.bf16.mxu0 %v108_v32  ;;  %v2660_v39 = vld [vmem:[%s3472_s4 + $0x100] sm:$0xff]   ;;  %v103_v40 = vld [vmem:[%s3468_s0 + $0x10] sm:$0xff] }
  0x34   :  { %2371 = vmatprep.subr.bf16.mxu1 %v2641_v14  ;;  %v110_v38 = vpack.c.bf16 %v104_v37, %v104_v37  ;;  %v109_v41 = vpack.c.bf16 %v103_v40, %v103_v40  ;;  %v2661_v42 = vld [vmem:[%s3472_s4 + $0x148] sm:$0xff]   ;;  %v2663_v44 = vld [vmem:[%s3472_s4 + $0x150] sm:$0xff]   ;;  %v2665_v46 = vld [vmem:[%s3472_s4 + $0x158] sm:$0xff]  }
  0x35   :  { %2350 = vmatpush3.bf16.msra.mxu0 %v2640_v13  ;;  %v2662_v43 = vld [vmem:[%s3472_s4 + $0x108] sm:$0xff]   ;;  %v2664_v45 = vld [vmem:[%s3472_s4 + $0x110] sm:$0xff]   ;;  %v2666_v47 = vld [vmem:[%s3472_s4 + $0x118] sm:$0xff]  }
  0x36   :  { %2351 = vmatprep.subr.bf16.mxu0 %v2643_v16  ;;  %573 = vmatprep.mubr.bf16.mxu1 %v110_v38  ;;  %v2667_v48 = vld [vmem:[%s3472_s4 + $0x160] sm:$0xff]   ;;  %v2669_v50 = vld [vmem:[%s3472_s4 + $0x168] sm:$0xff]   ;;  %v2671_v54 = vld [vmem:[%s3472_s4 + $0x170] sm:$0xff]  }
  0x37   :  { %2372 = vmatpush3.bf16.msra.mxu1 %v2642_v15  ;;  %v2668_v49 = vld [vmem:[%s3472_s4 + $0x120] sm:$0xff]   ;;  %v106_v51 = vld [vmem:[%s3468_s0 + $0x28] sm:$0xff]  ;;  %v2672_v55 = vld [vmem:[%s3472_s4 + $0x130] sm:$0xff]  }
  0x38   :  { %2373 = vmatprep.subr.bf16.mxu1 %v2645_v18  ;;  %v2670_v52 = vld [vmem:[%s3472_s4 + $0x128] sm:$0xff]   ;;  %v112_v53 = vpack.c.bf16 %v106_v51, %v106_v51  ;;  %v2673_v56 = vld [vmem:[%s3472_s4 + $0x178] sm:$0xff]   ;;  %v105_v58 = vld [vmem:[%s3468_s0 + $0x20] sm:$0xff]  ;;  %v209_v51 = vlaneseq  ;;  %s2881_s0 = smov 8  }
  0x39   :  { %2352 = vmatpush3.bf16.msra.mxu0 %v2644_v17  ;;  %v2674_v57 = vld [vmem:[%s3472_s4 + $0x138] sm:$0xff]   ;;  %v111_v59 = vpack.c.bf16 %v105_v58, %v105_v58  ;;  %v62_v60 = vld [vmem:[#allocation5 + $0x8] sm:$0xff]  ;;  %v61_v63 = vld [vmem:[#allocation5] sm:$0xff]  ;;  %s2882_s4 = smov 24  }
  0x3a   :  { %2353 = vmatprep.subr.bf16.mxu0 %v2647_v20  ;;  %v64_v61 = vld [vmem:[#allocation5 + $0x18] sm:$0xff]  ;;  %v63_v0 = vld [vmem:[#allocation5 + $0x10] sm:$0xff]  ;;  %v66_v2 = vld [vmem:[#allocation5 + $0x28] sm:$0xff] }
  0x3b   :  { %2374 = vmatpush3.bf16.msra.mxu1 %v2646_v19  ;;  %v89_v62 = vpack.c.bf16 %v64_v61, %v62_v60  ;;  %v88_v1 = vpack.c.bf16 %v63_v0, %v61_v63  ;;  %v68_v3 = vld [vmem:[#allocation5 + $0x38] sm:$0xff]  ;;  %v65_v5 = vld [vmem:[#allocation5 + $0x20] sm:$0xff]  ;;  %v67_v6 = vld [vmem:[#allocation5 + $0x30] sm:$0xff] }
  0x3c   :  { %2375 = vmatprep.subr.bf16.mxu1 %v2649_v22  ;;  %v91_v4 = vpack.c.bf16 %v68_v3, %v66_v2  ;;  %v90_v7 = vpack.c.bf16 %v67_v6, %v65_v5  ;;  %v2675_v8 = vld [vmem:[#allocation2 + $0x40] sm:$0xff]   ;;  %v2681_v12 = vld [vmem:[#allocation2 + $0xc8] sm:$0xff]   ;;  %v2685_v14 = vld [vmem:[#allocation2 + $0xd0] sm:$0xff]  }
  0x3d   :  { %2354 = vmatpush3.bf16.msra.mxu0 %v2648_v21  ;;  %v2677_v10 = vld [vmem:[#allocation2 + $0xc0] sm:$0xff]   ;;  %v2682_v13 = vld [vmem:[#allocation2 + $0x88] sm:$0xff]   ;;  %v2686_v15 = vld [vmem:[#allocation2 + $0x90] sm:$0xff]  }
  0x3e   :  { %2355 = vmatprep.subr.bf16.mxu0 %v2651_v24  ;;  %v2678_v11 = vld [vmem:[#allocation2 + $0x80] sm:$0xff]   ;;  %v2689_v16 = vld [vmem:[#allocation2 + $0xd8] sm:$0xff]   ;;  %v2697_v20 = vld [vmem:[#allocation2 + $0xe8] sm:$0xff]  }
  0x3f   :  { %2376 = vmatpush3.bf16.msra.mxu1 %v2650_v23  ;;  %v2690_v17 = vld [vmem:[#allocation2 + $0x98] sm:$0xff]   ;;  %v2693_v18 = vld [vmem:[#allocation2 + $0xe0] sm:$0xff]   ;;  %v2698_v21 = vld [vmem:[#allocation2 + $0xa8] sm:$0xff]  }
  0x40   :  { %2377 = vmatprep.subr.bf16.mxu1 %v2653_v26  ;;  %v2694_v19 = vld [vmem:[#allocation2 + $0xa0] sm:$0xff]   ;;  %v2701_v22 = vld [vmem:[#allocation2 + $0xf0] sm:$0xff]   ;;  %v2705_v24 = vld [vmem:[#allocation2 + $0xf8] sm:$0xff]  }
  0x41   :  { %2356 = vmatpush3.bf16.msra.mxu0 %v2652_v25  ;;  %v2702_v23 = vld [vmem:[#allocation2 + $0xb0] sm:$0xff]   ;;  %v2706_v25 = vld [vmem:[#allocation2 + $0xb8] sm:$0xff]   ;;  %v2710_v31 = vld [vmem:[#allocation2 + $0x180] sm:$0xff]  }
  0x42   :  { %2357 = vmatprep.subr.bf16.mxu0 %v2655_v28  ;;  %v679_v26 = vld [vmem:[%s3469_s1 + $0x18] sm:$0xff]  ;;  %v678_v28 = vld [vmem:[%s3469_s1 + $0x10] sm:$0xff]  ;;  %v2713_v32 = vld [vmem:[#allocation2 + $0x1c8] sm:$0xff]  }
  0x43   :  { %2378 = vmatpush3.bf16.msra.mxu1 %v2654_v27  ;;  %v687_v27 = vpack.c.bf16 %v679_v26, %v679_v26  ;;  %v2717_v34 = vld [vmem:[#allocation2 + $0x1d0] sm:$0xff]   ;;  %v2722_v37 = vld [vmem:[#allocation2 + $0x198] sm:$0xff]   ;;  %v2725_v38 = vld [vmem:[#allocation2 + $0x1e0] sm:$0xff]  }
  0x44   :  { %2379 = vmatprep.subr.bf16.mxu1 %v2657_v30  ;;  %v2709_v30 = vld [vmem:[#allocation2 + $0x1c0] sm:$0xff]   ;;  %v2729_v40 = vld [vmem:[#allocation2 + $0x1e8] sm:$0xff]   ;;  %v2703_v26 = vld [vmem:[#allocation2 + $0x78] sm:$0xff]  }
  0x45   :  { %2358 = vmatpush3.bf16.msra.mxu0 %v2656_v29  ;;  %v686_v29 = vpack.c.bf16 %v678_v28, %v678_v28  ;;  %v676_v28 = vld [vmem:[%s3469_s1] sm:$0xff]  ;;  %vm3200_vm6 = vmpackc.low %vm630_vm1, %vm630_vm1 }
  0x46   :  { %2387 = vmatprep.subr.bf16.mxu0 %v2659_v36  ;;  %v2721_v36 = vld [vmem:[#allocation2 + $0x1d8] sm:$0xff]  }
  0x47   :  { %2380 = vmatpush3.bf16.msra.mxu1 %v2658_v33  ;;  %v2714_v33 = vld [vmem:[#allocation2 + $0x188] sm:$0xff]  }
  0x48   :  { %534 = vmatmul.mubr.bf16.vlgmr.msra.gmra.mrb[0].mxu0 %v107_v35  ;;  %634 = vmatprep.subr.bf16.mxu1 %v89_v62  ;;  %v2718_v35 = vld [vmem:[#allocation2 + $0x190] sm:$0xff]  }
  0x49   :  { %2388 = vmatpush3.bf16.msra.mxu0 %v2660_v39  ;;  %613 = vmatprep.mubr.bf16.mxu0 %v112_v53  ;;  %v2726_v39 = vld [vmem:[#allocation2 + $0x1a0] sm:$0xff]  }
  0x4a   :  { %574 = vmatmul.mubr.bf16.vlgmr.msra.gmra.mrb[0].mxu1 %v109_v41  ;;  %2389 = vmatprep.subr.bf16.mxu0 %v2661_v42  ;;  %v2730_v41 = vld [vmem:[#allocation2 + $0x1a8] sm:$0xff]   ;;  %v2733_v42 = vld [vmem:[#allocation2 + $0x1f0] sm:$0xff]  }
  0x4b   :  { %635 = vmatpush1.bf16.msra.mxu1 %v88_v1  ;;  %666 = vmatprep.mubr.bf16.mxu1 %v2875_v9 }
  0x4c   :  { %636 = vmatprep.subr.bf16.mxu1 %v91_v4 }
  0x4d   :  { %2390 = vmatpush3.bf16.msra.mxu0 %v2662_v43  ;;  %v2734_v43 = vld [vmem:[#allocation2 + $0x1b0] sm:$0xff]  }
  0x4e   :  { %2391 = vmatprep.subr.bf16.mxu0 %v2663_v44  ;;  %v2737_v44 = vld [vmem:[#allocation2 + $0x1f8] sm:$0xff]  }
  0x4f   :  { %637 = vmatpush1.bf16.msra.mxu1 %v90_v7 }
  0x50   :  { %2409 = vmatprep.subr.bf16.mxu1 %v2675_v8  ;;  %v677_v8 = vld [vmem:[%s3469_s1 + $0x8] sm:$0xff] }
  0x51   :  { %2392 = vmatpush3.bf16.msra.mxu0 %v2664_v45  ;;  %v2738_v45 = vld [vmem:[#allocation2 + $0x1b8] sm:$0xff]  }
  0x52   :  { %2393 = vmatprep.subr.bf16.mxu0 %v2665_v46  ;;  %v683_v46 = vld [vmem:[%s3469_s1 + $0x38] sm:$0xff] }
  0x55   :  { %2394 = vmatpush3.bf16.msra.mxu0 %v2666_v47  ;;  %v691_v47 = vpack.c.bf16 %v683_v46, %v683_v46  ;;  %v2735_v46 = vld [vmem:[#allocation2 + $0x178] sm:$0xff]  }
  0x56   :  { %2395 = vmatprep.subr.bf16.mxu0 %v2667_v48  ;;  %v682_v48 = vld [vmem:[%s3469_s1 + $0x30] sm:$0xff] }
  0x59   :  { %2396 = vmatpush3.bf16.msra.mxu0 %v2668_v49  ;;  %v690_v49 = vpack.c.bf16 %v682_v48, %v682_v48  ;;  %v680_v48 = vld [vmem:[%s3469_s1 + $0x20] sm:$0xff] }
  0x5a   :  { %2397 = vmatprep.subr.bf16.mxu0 %v2669_v50  ;;  %v2876_v50 = vmov 0.0  }
  0x5d   :  { %2398 = vmatpush3.bf16.msra.mxu0 %v2670_v52  ;;  %v3137_v52 = vshrl.u32 %v209_v51, 7 }
  0x5e   :  { %2399 = vmatprep.subr.bf16.mxu0 %v2671_v54  ;;  %v3143_v54 = vld [vmem:[%s3475_s7] sm:$0xff] }
  0x5f   :  { %v211_v53 = vsub.s32 0, %v3137_v52  ;;  %vm1665_vm10 = vcmp.lt.s32.totalorder %v3137_v52, 2 }
  0x61   :  { %2400 = vmatpush3.bf16.msra.mxu0 %v2672_v55 }
  0x62   :  { %2401 = vmatprep.subr.bf16.mxu0 %v2673_v56  ;;  %v212_v56 = vrot.slane %v3143_v54, %v211_v53  ;;  %v70_v53 = vld [vmem:[#allocation5 + $0x50] sm:$0xff] }
  0x65   :  { %2402 = vmatpush3.bf16.msra.mxu0 %v2674_v57 }
  0x66   :  { %2431 = vmatprep.subr.bf16.mxu0 %v2677_v10 }
  0x68   :  { %614 = vmatmul.mubr.bf16.vlgmr.msra.gmra.mrb[4].mxu0 %v111_v59 }
  0x69   :  { %2432 = vmatpush3.bf16.msra.mxu0 %v2678_v11  ;;  %1280 = vmatprep.mubr.bf16.mxu0 %v687_v27  ;;  %v2676_v11 = vld [vmem:[#allocation2] sm:$0xff]   ;;  %v2704_v27 = vld [vmem:[#allocation2 + $0x38] sm:$0xff]  }
  0x6a   :  { %2433 = vmatprep.subr.bf16.mxu0 %v2681_v12  ;;  %v685_v12 = vpack.c.bf16 %v677_v8, %v677_v8  ;;  %v72_v8 = vld [vmem:[#allocation5 + $0x70] sm:$0xff] }
  0x6d   :  { %2434 = vmatpush3.bf16.msra.mxu0 %v2682_v13 }
  0x6e   :  { %2435 = vmatprep.subr.bf16.mxu0 %v2685_v14  ;;  %v2679_v14 = vld [vmem:[#allocation2 + $0x48] sm:$0xff]  }
  0x71   :  { %2436 = vmatpush3.bf16.msra.mxu0 %v2686_v15  ;;  %v2680_v15 = vld [vmem:[#allocation2 + $0x8] sm:$0xff]  }
  0x72   :  { %2437 = vmatprep.subr.bf16.mxu0 %v2689_v16  ;;  %v2683_v16 = vld [vmem:[#allocation2 + $0x50] sm:$0xff]  }
  0x75   :  { %2438 = vmatpush3.bf16.msra.mxu0 %v2690_v17  ;;  %v2684_v17 = vld [vmem:[#allocation2 + $0x10] sm:$0xff]  }
  0x76   :  { %2439 = vmatprep.subr.bf16.mxu0 %v2693_v18  ;;  %v2687_v18 = vld [vmem:[#allocation2 + $0x58] sm:$0xff]  }
  0x79   :  { %2440 = vmatpush3.bf16.msra.mxu0 %v2694_v19  ;;  %v2688_v19 = vld [vmem:[#allocation2 + $0x18] sm:$0xff]  }
  0x7a   :  { %2441 = vmatprep.subr.bf16.mxu0 %v2697_v20  ;;  %v2691_v20 = vld [vmem:[#allocation2 + $0x60] sm:$0xff]  }
  0x7d   :  { %2442 = vmatpush3.bf16.msra.mxu0 %v2698_v21  ;;  %v2692_v21 = vld [vmem:[#allocation2 + $0x20] sm:$0xff]  }
  0x7e   :  { %2443 = vmatprep.subr.bf16.mxu0 %v2701_v22  ;;  %v2695_v22 = vld [vmem:[#allocation2 + $0x68] sm:$0xff]  }
  0x81   :  { %2444 = vmatpush3.bf16.msra.mxu0 %v2702_v23  ;;  %v2696_v23 = vld [vmem:[#allocation2 + $0x28] sm:$0xff]  }
  0x82   :  { %2445 = vmatprep.subr.bf16.mxu0 %v2705_v24  ;;  %v2699_v24 = vld [vmem:[#allocation2 + $0x70] sm:$0xff]  }
  0x85   :  { %2446 = vmatpush3.bf16.msra.mxu0 %v2706_v25  ;;  %v2700_v25 = vld [vmem:[#allocation2 + $0x30] sm:$0xff]  }
  0x86   :  { %2475 = vmatprep.subr.bf16.mxu0 %v2709_v30  ;;  %v681_v30 = vld [vmem:[%s3469_s1 + $0x28] sm:$0xff] }
  0x88   :  { %1281 = vmatmul.mubr.bf16.vlgmr.msra.gmra.mrb[8].mxu0 %v686_v29  ;;  %v2707_v29 = vld [vmem:[#allocation2 + $0x140] sm:$0xff]  }
  0x89   :  { %2476 = vmatpush3.bf16.msra.mxu0 %v2710_v31  ;;  %1360 = vmatprep.mubr.bf16.mxu0 %v691_v47  ;;  %v684_v31 = vpack.c.bf16 %v676_v28, %v676_v28  ;;  %v2736_v47 = vld [vmem:[#allocation2 + $0x138] sm:$0xff]  }
  0x8a   :  { %2477 = vmatprep.subr.bf16.mxu0 %v2713_v32  ;;  %v2708_v32 = vld [vmem:[#allocation2 + $0x100] sm:$0xff]  }
  0x8d   :  { %2478 = vmatpush3.bf16.msra.mxu0 %v2714_v33  ;;  %v689_v33 = vpack.c.bf16 %v681_v30, %v681_v30 }
  0x8e   :  { %2479 = vmatprep.subr.bf16.mxu0 %v2717_v34  ;;  %v2711_v34 = vld [vmem:[#allocation2 + $0x148] sm:$0xff]  }
  0x91   :  { %2480 = vmatpush3.bf16.msra.mxu0 %v2718_v35  ;;  %v2712_v35 = vld [vmem:[#allocation2 + $0x108] sm:$0xff]  }
  0x92   :  { %2481 = vmatprep.subr.bf16.mxu0 %v2721_v36  ;;  %v2715_v36 = vld [vmem:[#allocation2 + $0x150] sm:$0xff]  }
  0x95   :  { %2482 = vmatpush3.bf16.msra.mxu0 %v2722_v37  ;;  %v2716_v37 = vld [vmem:[#allocation2 + $0x110] sm:$0xff]  }
  0x96   :  { %2483 = vmatprep.subr.bf16.mxu0 %v2725_v38  ;;  %v2719_v38 = vld [vmem:[#allocation2 + $0x158] sm:$0xff]  }
  0x99   :  { %2484 = vmatpush3.bf16.msra.mxu0 %v2726_v39  ;;  %v2720_v39 = vld [vmem:[#allocation2 + $0x118] sm:$0xff]  }
  0x9a   :  { %2485 = vmatprep.subr.bf16.mxu0 %v2729_v40  ;;  %v2723_v40 = vld [vmem:[#allocation2 + $0x160] sm:$0xff]  }
  0x9d   :  { %2486 = vmatpush3.bf16.msra.mxu0 %v2730_v41  ;;  %v2724_v41 = vld [vmem:[#allocation2 + $0x120] sm:$0xff]  }
  0x9e   :  { %2487 = vmatprep.subr.bf16.mxu0 %v2733_v42  ;;  %v2727_v42 = vld [vmem:[#allocation2 + $0x168] sm:$0xff]  }
  0xa1   :  { %2488 = vmatpush3.bf16.msra.mxu0 %v2734_v43  ;;  %v2728_v43 = vld [vmem:[#allocation2 + $0x128] sm:$0xff]  }
  0xa2   :  { %2489 = vmatprep.subr.bf16.mxu0 %v2737_v44  ;;  %v2731_v44 = vld [vmem:[#allocation2 + $0x170] sm:$0xff]  }
  0xa5   :  { %2490 = vmatpush3.bf16.msra.mxu0 %v2738_v45  ;;  %v2732_v45 = vld [vmem:[#allocation2 + $0x130] sm:$0xff]  }
  0xa6   :  { %2537 = vmatprep.subr.bf16.mxu0 %v2876_v50 }
  0xa8   :  { %1361 = vmatmul.mubr.bf16.vlgmr.msra.gmra.mrb[12].mxu0 %v690_v49  ;;  %v69_v49 = vld [vmem:[#allocation5 + $0x40] sm:$0xff] }
  0xa9   :  { %2543 = vmatprep.mubr.msk.bf16.mxu0 %vm2877_vm0, %v2876_v50 }
 0x11b   :  { %v2359_v55 = vpop.f32.mrb[0].mxu0 }
 0x11c   :  { %v2360_v57 = vpop.f32.mrb[1].mxu0 }
 0x11d   :  { %v2361_v58 = vadd.f32 %v2360_v57, %v2359_v55  ;;  %v2362_v59 = vpop.f32.mrb[2].mxu0  ;;  %v2381_v60 = vpop.f32.mrb[0].mxu1  ;;  %v71_v55 = vld [vmem:[#allocation5 + $0x60] sm:$0xff]  ;;  %v92_v57 = vpack.c.bf16 %v70_v53, %v69_v49 }
 0x11e   :  { %v2363_v61 = vpop.f32.mrb[3].mxu0  ;;  %v2382_v63 = vpop.f32.mrb[1].mxu1  ;;  %v1368_v59 = vld [vmem:[%s3470_s2] sm:$0xff] }
 0x11f   :  { %v536_v62 = vadd.f32 %v2361_v58, %v212_v56  ;;  %v2383_v0 = vadd.f32 %v2382_v63, %v2381_v60  ;;  %v2384_v1 = vpop.f32.mrb[2].mxu1  ;;  %v688_v56 = vpack.c.bf16 %v680_v48, %v680_v48  ;;  %v93_v58 = vpack.c.bf16 %v71_v55, %v71_v55 }
 0x120   :  { %v2385_v2 = vpop.f32.mrb[3].mxu1  ;;  %v1369_v61 = vpack.c.bf16 %v1368_v59, %v1368_v59 }
 0x121   :  { %v576_v3 = vadd.f32 %v2383_v0, %v536_v62  ;;  %v1380_v60 = vsel %vm1378_vm2, %v93_v58, 0  ;;  %v1372_v58 = vsub.s32 3, %v3137_v52 }
 0x13b   :  { %v2403_v4 = vpop.f32.mrb[4].mxu0 }
 0x13c   :  { %v2404_v5 = vpop.f32.mrb[5].mxu0 }
 0x13d   :  { %v2405_v6 = vadd.f32 %v2404_v5, %v2403_v4  ;;  %v2406_v7 = vpop.f32.mrb[6].mxu0 }
 0x13e   :  { %v2407_v9 = vpop.f32.mrb[7].mxu0 }
 0x13f   :  { %v616_v10 = vadd.f32 %v2405_v6, %v576_v3  ;;  %v73_v9 = vld [vmem:[#allocation5 + $0x80] sm:$0xff] }
 0x141   :  { %v621_v13 = vpack.c.bf16 %v616_v10, %v616_v10  ;;  %v94_v10 = vpack.c.bf16 %v73_v9, %v72_v8 }
 0x143   :  { %2264 = vmatmul.mubr.msk.bf16.vlgmr.msra.gmra.mrb[4].mxu1 %vm630_vm1, %v621_v13  ;;  %v80_v13 = vld [vmem:[#allocation5 + $0xf0] sm:$0xff] }
 0x144   :  { %2410 = vmatpush3.bf16.msra.mxu1 %v2676_v11  ;;  %1240 = vmatprep.mubr.bf16.mxu1 %v685_v12  ;;  %v74_v11 = vld [vmem:[#allocation5 + $0x90] sm:$0xff]  ;;  %v75_v12 = vld [vmem:[#allocation5 + $0xa0] sm:$0xff] }
 0x145   :  { %2411 = vmatprep.subr.bf16.mxu1 %v2679_v14  ;;  %v81_v14 = vld [vmem:[#allocation5 + $0x100] sm:$0xff] }
 0x148   :  { %2412 = vmatpush3.bf16.msra.mxu1 %v2680_v15  ;;  %v95_v15 = vpack.c.bf16 %v75_v12, %v74_v11 }
 0x149   :  { %2413 = vmatprep.subr.bf16.mxu1 %v2683_v16  ;;  %v98_v16 = vpack.c.bf16 %v81_v14, %v80_v13 }
 0x14b   :  { %2538 = vmatpush3.bf16.msra.mxu0 %v98_v16 }
 0x14c   :  { %2414 = vmatpush3.bf16.msra.mxu1 %v2684_v17  ;;  %v82_v17 = vld [vmem:[#allocation5 + $0x110] sm:$0xff]  ;;  %2539 = vmatprep.subr.bf16.mxu0 %v2876_v50 }
 0x14d   :  { %2415 = vmatprep.subr.bf16.mxu1 %v2687_v18  ;;  %v83_v18 = vld [vmem:[#allocation5 + $0x120] sm:$0xff] }
 0x150   :  { %2416 = vmatpush3.bf16.msra.mxu1 %v2688_v19  ;;  %v76_v19 = vld [vmem:[#allocation5 + $0xb0] sm:$0xff] }
 0x151   :  { %2417 = vmatprep.subr.bf16.mxu1 %v2691_v20  ;;  %v77_v20 = vld [vmem:[#allocation5 + $0xc0] sm:$0xff] }
 0x154   :  { %2418 = vmatpush3.bf16.msra.mxu1 %v2692_v21  ;;  %v99_v21 = vpack.c.bf16 %v83_v18, %v82_v17 }
 0x155   :  { %2419 = vmatprep.subr.bf16.mxu1 %v2695_v22  ;;  %v84_v22 = vld [vmem:[#allocation5 + $0x130] sm:$0xff] }
 0x156   :  { %2540 = vmatpush3.bf16.msra.mxu0 %v99_v21 }
 0x157   :  { %2541 = vmatprep.subr.bf16.mxu0 %v2876_v50 }
 0x158   :  { %2420 = vmatpush3.bf16.msra.mxu1 %v2696_v23  ;;  %v85_v23 = vld [vmem:[#allocation5 + $0x140] sm:$0xff] }
 0x159   :  { %2421 = vmatprep.subr.bf16.mxu1 %v2699_v24  ;;  %v96_v24 = vpack.c.bf16 %v77_v20, %v76_v19 }
 0x15b   :  { %v2447_v62 = vpop.f32.mrb[8].mxu0 }
 0x15c   :  { %2422 = vmatpush3.bf16.msra.mxu1 %v2700_v25  ;;  %v2448_v63 = vpop.f32.mrb[9].mxu0  ;;  %v78_v25 = vld [vmem:[#allocation5 + $0xd0] sm:$0xff] }
 0x15d   :  { %2423 = vmatprep.subr.bf16.mxu1 %v2703_v26  ;;  %v3169_v0 = vadd.f32 %v2448_v63, %v2447_v62  ;;  %v2450_v1 = vpop.f32.mrb[10].mxu0  ;;  %v79_v26 = vld [vmem:[#allocation5 + $0xe0] sm:$0xff]  ;;  %v1373_v63 = vrot.slane %v3143_v54, %v1372_v58 }
 0x15e   :  { %v2451_v2 = vpop.f32.mrb[11].mxu0  ;;  %v97_v28 = vpack.c.bf16 %v79_v26, %v78_v25 }
 0x160   :  { %2424 = vmatpush3.bf16.msra.mxu1 %v2704_v27  ;;  %v100_v27 = vpack.c.bf16 %v85_v23, %v84_v22 }
 0x161   :  { %2453 = vmatprep.subr.bf16.mxu1 %v2707_v29  ;;  %v1480_v29 = vld [vmem:[%s3471_s3] sm:$0xff]  ;;  %s2878_s3 = smov 112  }
 0x162   :  { %2542 = vmatpush3.bf16.msra.mxu0 %v100_v27  ;;  %v1481_v30 = vpack.c.bf16 %v1480_v29, %v1480_v29 }
 0x163   :  { %1241 = vmatmul.mubr.bf16.vlgmr.msra.gmra.mrb[8].mxu1 %v684_v31  ;;  %v624_v31 = vsub.s32 1, %v3137_v52 }
 0x164   :  { %2454 = vmatpush3.bf16.msra.mxu1 %v2708_v32  ;;  %1320 = vmatprep.mubr.bf16.mxu1 %v689_v33  ;;  %v87_v32 = vld [vmem:[%s3475_s7 + $0x8] sm:$0xff]  ;;  %s2879_s7 = smov 120  }
 0x165   :  { %2455 = vmatprep.subr.bf16.mxu1 %v2711_v34  ;;  %2544 = vmatmul.mubr.msk.bf16.vlgmr.msra.gmra.mrb[16].mxu0 %vm1486_vm4, %v1481_v30  ;;  %v625_v33 = vrot.slane %v3143_v54, %v624_v31  ;;  %v629_v34 = vrot.slane %v87_v32, %v624_v31  ;;  %v1484_v32 = vsub.s32 5, %v3137_v52 }
 0x168   :  { %2456 = vmatpush3.bf16.msra.mxu1 %v2712_v35 }
 0x169   :  { %2457 = vmatprep.subr.bf16.mxu1 %v2715_v36 }
 0x16c   :  { %2458 = vmatpush3.bf16.msra.mxu1 %v2716_v37 }
 0x16d   :  { %2459 = vmatprep.subr.bf16.mxu1 %v2719_v38 }
 0x170   :  { %2460 = vmatpush3.bf16.msra.mxu1 %v2720_v39 }
 0x171   :  { %2461 = vmatprep.subr.bf16.mxu1 %v2723_v40 }
 0x174   :  { %2462 = vmatpush3.bf16.msra.mxu1 %v2724_v41 }
 0x175   :  { %2463 = vmatprep.subr.bf16.mxu1 %v2727_v42 }
 0x178   :  { %2464 = vmatpush3.bf16.msra.mxu1 %v2728_v43  ;;  %v822_v43 = vsub.s32 2, %v3137_v52 }
 0x179   :  { %2465 = vmatprep.subr.bf16.mxu1 %v2731_v44 }
 0x17b   :  { %v2491_v3 = vpop.f32.mrb[12].mxu0 }
 0x17c   :  { %2466 = vmatpush3.bf16.msra.mxu1 %v2732_v45  ;;  %v2492_v4 = vpop.f32.mrb[13].mxu0  ;;  %v823_v45 = vrot.slane %v3143_v54, %v822_v43 }
 0x17d   :  { %2467 = vmatprep.subr.bf16.mxu1 %v2735_v46  ;;  %v3171_v5 = vadd.f32 %v2492_v4, %v2491_v3  ;;  %v2494_v6 = vpop.f32.mrb[14].mxu0 }
 0x17e   :  { %v2495_v7 = vpop.f32.mrb[15].mxu0 }
 0x180   :  { %2468 = vmatpush3.bf16.msra.mxu1 %v2736_v47 }
 0x181   :  { %2517 = vmatprep.subr.bf16.mxu1 %v2876_v50 }
 0x183   :  { %1321 = vmatmul.mubr.bf16.vlgmr.msra.gmra.mrb[12].mxu1 %v688_v56 }
 0x184   :  { %2518 = vmatpush3.bf16.msra.mxu1 %v92_v57  ;;  %2521 = vmatprep.mubr.msk.bf16.mxu1 %vm2877_vm0, %v2876_v50 }
 0x185   :  { %2519 = vmatprep.subr.bf16.mxu1 %v2876_v50 }
 0x188   :  { %2520 = vmatpush3.bf16.msra.mxu1 %v1380_v60 }
 0x189   :  { %2525 = vmatprep.subr.bf16.mxu1 %v2876_v50 }
 0x18b   :  { %2522 = vmatmul.mubr.msk.bf16.vlgmr.msra.gmra.mrb[16].mxu1 %vm1374_vm3, %v1369_v61 }
 0x18c   :  { %2533 = vmatprep.mubr.msk.bf16.mxu1 %vm2877_vm0, %v2876_v50  ;;  %2526 = vmatpush3.bf16.msra.mxu1 %v94_v10 }
 0x18d   :  { %2527 = vmatprep.subr.bf16.mxu1 %v2876_v50 }
 0x190   :  { %2528 = vmatpush3.bf16.msra.mxu1 %v95_v15 }
 0x191   :  { %2529 = vmatprep.subr.bf16.mxu1 %v2876_v50 }
 0x194   :  { %2530 = vmatpush3.bf16.msra.mxu1 %v96_v24 }
 0x195   :  { %2531 = vmatprep.subr.bf16.mxu1 %v2876_v50 }
 0x198   :  { %2532 = vmatpush3.bf16.msra.mxu1 %v97_v28 }
 0x216   :  { %v668_v35 = vpop.f32.mrb[4].mxu1 }
 0x217   :  { %v669_v36 = vadd.f32 %v668_v35, %v625_v33  ;;  %v670_v37 = vpop.f32.mrb[5].mxu1  ;;  %v1434_v33 = vsub.s32 4, %v3137_v52 }
 0x218   :  { %v671_v38 = vadd.f32 %v670_v37, %v629_v34  ;;  %v672_v39 = vpop.f32.mrb[6].mxu1  ;;  %v1485_v34 = vrot.slane %v3143_v54, %v1484_v32 }
 0x219   :  { %675 = vst [vmem:[%s3476_s8] sm:$0xff] %v669_v36  ;;  %v673_v40 = vpop.f32.mrb[7].mxu1  ;;  %v1435_v35 = vrot.slane %v3143_v54, %v1434_v33  ;;  %s2880_s8 = smov 104  }
 0x21a   :  { %v1530_v41 = vmul.f32 %v671_v38, %v671_v38 }
 0x21c   :  { %v1531_v42 = vsel %vm630_vm1, %v1530_v41, 0.0 }
 0x21d   :  { %1532 = vadd.xlane.f32.xlu0 %v1531_v42 }
 0x236   :  { %v2425_v44 = vpop.f32.mrb[8].mxu1 }
 0x237   :  { %v2426_v46 = vpop.f32.mrb[9].mxu1 }
 0x238   :  { %v2427_v47 = vadd.f32 %v2426_v46, %v2425_v44  ;;  %v2428_v48 = vpop.f32.mrb[10].mxu1  ;;  %v1524_v22 = vpop.f32.mrb[16].mxu0 }
 0x239   :  { %v2429_v49 = vpop.f32.mrb[11].mxu1  ;;  %v2545_v23 = vpop.f32.mrb[17].mxu0  ;;  %v1525_v36 = vadd.f32 %v1524_v22, %v1485_v34 }
 0x23a   :  { %v1243_v53 = vadd.f32 %v2427_v47, %v823_v45  ;;  %v1527_v24 = vpop.f32.mrb[18].mxu0 }
 0x23b   :  { %v2546_v25 = vpop.f32.mrb[19].mxu0  ;;  %v1551_v43 = vmul.f32 %v1525_v36, %v1525_v36 }
 0x23c   :  { %v1283_v55 = vadd.f32 %v3169_v0, %v1243_v53 }
 0x23d   :  { %v1552_v45 = vsel %vm630_vm1, %v1551_v43, 0.0 }
 0x256   :  { %v2469_v56 = vpop.f32.mrb[12].mxu1 }
 0x257   :  { %v2470_v57 = vpop.f32.mrb[13].mxu1 }
 0x258   :  { %v2471_v59 = vadd.f32 %v2470_v57, %v2469_v56  ;;  %v2472_v60 = vpop.f32.mrb[14].mxu1 }
 0x259   :  { %v2473_v61 = vpop.f32.mrb[15].mxu1 }
 0x25a   :  { %v1323_v62 = vadd.f32 %v2471_v59, %v1283_v55 }
 0x25c   :  { %v1363_v1 = vadd.f32 %v3171_v5, %v1323_v62 }
 0x25e   :  { %v1416_v2 = vpop.f32.mrb[16].mxu1  ;;  %v1537_v3 = vmul.f32 %v1363_v1, %v1363_v1 }
 0x25f   :  { %v1417_v4 = vadd.f32 %v1416_v2, %v1373_v63  ;;  %v2523_v6 = vpop.f32.mrb[17].mxu1  ;;  %v1660_v2 = vand.u32 127, %v209_v51 }
 0x260   :  { %v1419_v7 = vpop.f32.mrb[18].mxu1  ;;  %v1538_v8 = vsel %vm630_vm1, %v1537_v3, 0.0 }
 0x261   :  { %v1423_v0 = vmul.f32 0.044715, %v1417_v4  ;;  %v2524_v9 = vpop.f32.mrb[19].mxu1  ;;  %1539 = vadd.xlane.f32.xlu0 %v1538_v8  ;;  %v1422_v15 = vmul.f32 0.5, %v1417_v4  ;;  %vm1664_vm7 = vcmp.lt.s32.totalorder %v1660_v2, 2  ;;  %vm1661_vm9 = vcmp.eq.s32.totalorder %v3137_v52, %v1660_v2 }
 0x262   :  { %v2342_v22 = vsel %vm1664_vm7, 1.0, %v2876_v50 }
 0x263   :  { %v1424_v10 = vmul.f32 %v1423_v0, %v1417_v4 }
 0x265   :  { %v1425_v11 = vmul.f32 %v1424_v10, %v1417_v4 }
 0x267   :  { %v1426_v12 = vadd.f32 %v1425_v11, %v1417_v4 }
 0x269   :  { %v1427_v13 = vmul.f32 0.7978846, %v1426_v12 }
 0x26b   :  { %2739 = vtanh.f32 %v1427_v13 }
 0x275   :  { %v2740_v14 = vpop.eup %2739 }
 0x276   :  { %v1429_v16 = vadd.f32 1.0, %v2740_v14 }
 0x278   :  { %v1430_v17 = vmul.f32 %v1429_v16, %v1422_v15 }
 0x27a   :  { %v1431_v5 = vpack.c.bf16 %v1430_v17, %v1430_v17 }
 0x27c   :  { %2534 = vmatmul.mubr.msk.bf16.vlgmr.msra.gmra.mrb[20].mxu1 %vm1436_vm5, %v1431_v5  ;;  %v3262_v5 = vsel %vm1661_vm9, 1.0, %v2876_v50 }
 0x27d   :  { %v2612_v23 = vpack.i.bf16 %v2342_v22, %v3262_v5 }
 0x2aa   :  { %v1533_v18 = vpop.xlane.xlu0 %1532 }
 0x2ab   :  { %v1534_v19 = vadd.f32 1e-12, %v1533_v18 }
 0x2ad   :  { %2741 = vrsqrt.f32 %v1534_v19 }
 0x2b7   :  { %v2742_v20 = vpop.eup %2741 }
 0x2b8   :  { %v1536_v21 = vmul.f32 %v2742_v20, %v671_v38 }
 0x2ba   :  { %2555 = vmatprep.mubr.msk.f32.mxu1 %vm630_vm1, %v1536_v21 }
 0x2ee   :  { %v1540_v26 = vpop.xlane.xlu0 %1539 }
 0x2ef   :  { %v1541_v27 = vadd.f32 1e-12, %v1540_v26 }
 0x2f1   :  { %2743 = vrsqrt.f32 %v1541_v27 }
 0x2fb   :  { %v2744_v28 = vpop.eup %2743 }
 0x2fc   :  { %v1543_v29 = vmul.f32 %v2744_v28, %v1363_v1 }
 0x2fe   :  { %v2561_v31 = vpack.c.bf16 %v1543_v29, %v1536_v21 }
 0x300   :  { %2563 = vmatprep.subr.msk.bf16.mxu1 %vm3200_vm6, %v2561_v31 }
 0x301   :  { %2566 = vmatpush3.bf16.xpose.msk.msra.mxu1 %vm3200_vm6, %v2561_v31 }
 0x34f   :  { %v1474_v37 = vpop.f32.mrb[20].mxu1 }
 0x350   :  { %v1475_v38 = vadd.f32 %v1474_v37, %v1435_v35  ;;  %v2535_v39 = vpop.f32.mrb[21].mxu1 }
 0x351   :  { %v1477_v40 = vpop.f32.mrb[22].mxu1 }
 0x352   :  { %v2536_v41 = vpop.f32.mrb[23].mxu1  ;;  %v1544_v42 = vmul.f32 %v1475_v38, %v1475_v38 }
 0x354   :  { %v1545_v44 = vsel %vm630_vm1, %v1544_v42, 0.0 }
 0x355   :  { %1546 = vadd.xlane.f32.xlu1 %v1545_v44 }
 0x359   :  { %1553 = vadd.xlane.f32.xlu1 %v1552_v45 }
 0x3e2   :  { %v1547_v46 = vpop.xlane.xlu1 %1546 }
 0x3e3   :  { %v1548_v47 = vadd.f32 1e-12, %v1547_v46 }
 0x3e5   :  { %2745 = vrsqrt.f32 %v1548_v47 }
 0x3e6   :  { %v1554_v48 = vpop.xlane.xlu1 %1553 }
 0x3e7   :  { %v1555_v49 = vadd.f32 1e-12, %v1554_v48 }
 0x3e9   :  { %2747 = vrsqrt.f32 %v1555_v49 }
 0x3ef   :  { %v2746_v54 = vpop.eup %2745 }
 0x3f0   :  { %v1550_v55 = vmul.f32 %v2746_v54, %v1475_v38 }
 0x3f3   :  { %v2748_v53 = vpop.eup %2747 }
 0x3f4   :  { %v1557_v56 = vmul.f32 %v2748_v53, %v1525_v36 }
 0x3f6   :  { %v2567_v57 = vpack.c.bf16 %v1557_v56, %v1550_v55 }
 0x3f8   :  { %2569 = vmatprep.subr.msk.bf16.mxu1 %vm3200_vm6, %v2567_v57 }
 0x3f9   :  { %2572 = vmatpush3.bf16.xpose.msk.msra.mxu1 %vm3200_vm6, %v2567_v57 }
 0x400   :  { %2556 = vmatmul.mubr.msk.f32.vlgmr.msra.gmra.mrb[24].mxu1 %vm630_vm1, %v1543_v29 }
 0x401   :  { %2558 = vmatprep.mubr.msk.f32.mxu1 %vm630_vm1, %v1550_v55 }
 0x404   :  { %2559 = vmatmul.mubr.msk.f32.gmra.mrb[26].mxu1 %vm630_vm1, %v1557_v56 }
 0x4d3   :  { %v2557_v58 = vpop.f32.mrb[24].mxu1 }
 0x4d4   :  { %v1636_v59 = vpop.f32.mrb[25].mxu1  ;;  %v3223_v63 = vmul.f32 14.285714, %v2557_v58 }
 0x4d5   :  { %v1654_v60 = vmul.f32 14.285714, %v1636_v59 }
 0x4d7   :  { %1766 = vrot.lane.b32.xlu1 %v1654_v60, %s2878_s3  ;;  %1671 = vrot.lane.b32.xlu0 %v1654_v60, %s2879_s7  ;;  %v2560_v61 = vpop.f32.mrb[26].mxu1  ;;  %v3281_v26 = vsel %vm1665_vm10, %v1654_v60, -1e+30 }
 0x4d8   :  { %v1646_v62 = vpop.f32.mrb[27].mxu1  ;;  %v1710_v27 = vsel %vm1709_vm11, %v3281_v26, -inf }
 0x4d9   :  { %v3230_v1 = vmul.f32 14.285714, %v1646_v62  ;;  %v1711_v28 = vrot.slane %v1710_v27, 4 }
 0x4db   :  { %1855 = vrot.lane.b32.xlu1 %v1654_v60, %s2880_s8  ;;  %2028 = vrot.lane.b32.xlu0 %v3223_v63, %s2880_s8  ;;  %v1712_v29 = vmax.f32 %v1710_v27, %v1711_v28  ;;  %v1891_v27 = vsel %vm1890_vm13, %v3281_v26, -inf }
 0x4dd   :  { %v1713_v30 = vrot.slane %v1712_v29, 2 }
 0x4df   :  { %1945 = vrot.lane.b32.xlu1 %v3223_v63, %s2878_s3  ;;  %v1714_v31 = vmax.f32 %v1712_v29, %v1713_v30 }
 0x4e1   :  { %v1715_v32 = vrot.slane %v1714_v31, 1 }
 0x4e3   :  { %2111 = vrot.lane.b32.xlu1 %v3230_v1, %s2880_s8  ;;  %v1716_v33 = vmax.f32 %v1714_v31, %v1715_v32  ;;  %v1892_v31 = vrot.slane %v1891_v27, 4 }
 0x4e5   :  { %v1717_v34 = vsub.f32 %v3281_v26, %v1716_v33 }
 0x4e7   :  { %v1718_v35 = vmul.f32 1.442695, %v1717_v34 }
 0x4e9   :  { %2749 = vpow2.f32 %v1718_v35  ;;  %v1893_v35 = vmax.f32 %v1891_v27, %v1892_v31 }
 0x4f3   :  { %v2750_v36 = vpop.eup %2749 }
 0x4f4   :  { %v1720_v37 = vsel %vm1709_vm11, %v2750_v36, 0.0 }
 0x4f5   :  { %v1721_v38 = vrot.slane %v1720_v37, 4 }
 0x4f7   :  { %v1722_v39 = vadd.f32 %v1721_v38, %v1720_v37 }
 0x4f9   :  { %v1723_v40 = vrot.slane %v1722_v39, 2 }
 0x4fb   :  { %v1724_v41 = vadd.f32 %v1723_v40, %v1722_v39  ;;  %v1894_v39 = vrot.slane %v1893_v35, 2 }
 0x4fd   :  { %v1725_v43 = vrot.slane %v1724_v41, 1 }
 0x4ff   :  { %v1726_v45 = vadd.f32 %v1725_v43, %v1724_v41 }
 0x501   :  { %2751 = vlog2.f32 %v1726_v45  ;;  %v1895_v45 = vmax.f32 %v1893_v35, %v1894_v39 }
 0x50b   :  { %v2752_v56 = vpop.eup %2751 }
 0x50c   :  { %v1728_v58 = vmul.f32 0.6931472, %v2752_v56 }
 0x50e   :  { %v1729_v61 = vadd.f32 %v1728_v58, %v1716_v33 }
 0x549   :  { %v1767_v3 = vpop.permute.xlu1 %1766  ;;  %v1672_v4 = vpop.permute.xlu0 %1671 }
 0x54a   :  { %v3241_v9 = vsel %vm1664_vm7, %v1767_v3, -1e+30  ;;  %v3251_v13 = vsel %vm1664_vm7, %v1672_v4, -1e+30 }
 0x54b   :  { %v1770_v12 = vsel %vm1675_vm8, %v3241_v9, -inf  ;;  %v1676_v16 = vsel %vm1675_vm8, %v3251_v13, -inf  ;;  %v1688_v20 = vmul.f32 %v3262_v5, %v3251_v13  ;;  %v1782_v24 = vmul.f32 %v3262_v5, %v3241_v9 }
 0x54d   :  { %v1856_v6 = vpop.permute.xlu1 %1855  ;;  %v2029_v7 = vpop.permute.xlu0 %2028  ;;  %v1689_v21 = vsel %vm1675_vm8, %v1688_v20, 0.0  ;;  %v1783_v25 = vsel %vm1675_vm8, %v1782_v24, 0.0 }
 0x54e   :  { %v3236_v8 = vsel %vm1664_vm7, %v2029_v7, -1e+30  ;;  %v3265_v18 = vsel %vm1664_vm7, %v1856_v6, -1e+30 }
 0x54f   :  { %v2032_v0 = vsel %vm1675_vm8, %v3236_v8, -inf  ;;  %v1859_v19 = vsel %vm1675_vm8, %v3265_v18, -inf }
 0x550   :  { %2033 = vmax.xlane.f32.xlu1 %v2032_v0 }
 0x551   :  { %v1946_v10 = vpop.permute.xlu1 %1945 }
 0x552   :  { %v3244_v11 = vsel %vm1664_vm7, %v1946_v10, -1e+30 }
 0x553   :  { %v1949_v51 = vsel %vm1675_vm8, %v3244_v11, -inf }
 0x554   :  { %1950 = vmax.xlane.f32.xlu0 %v1949_v51  ;;  %1771 = vmax.xlane.f32.xlu1 %v1770_v12  ;;  %v1961_v12 = vmul.f32 %v3262_v5, %v3244_v11 }
 0x555   :  { %v2112_v14 = vpop.permute.xlu1 %2111 }
 0x556   :  { %v3255_v15 = vsel %vm1664_vm7, %v2112_v14, -1e+30 }
 0x557   :  { %v2115_v17 = vsel %vm1675_vm8, %v3255_v15, -inf }
 0x558   :  { %1677 = vmax.xlane.f32.xlu0 %v1676_v16  ;;  %2116 = vmax.xlane.f32.xlu1 %v2115_v17  ;;  %v1962_v17 = vsel %vm1675_vm8, %v1961_v12, 0.0 }
 0x55c   :  { %1860 = vmax.xlane.f32.xlu0 %v1859_v19  ;;  %v2044_v19 = vmul.f32 %v3262_v5, %v3236_v8 }
 0x560   :  { %1690 = vadd.xlane.f32.xlu0 %v1689_v21 }
 0x569   :  { %2613 = vrot.lane.b32.xlu1 %v2612_v23, %s2881_s0 }
 0x58d   :  { %1784 = vadd.xlane.f32.xlu1 %v1783_v25 }
 0x5dd   :  { %v3287_v42 = vpop.xlane.xlu1 %2033 }
 0x5de   :  { %v2035_v0 = vsub.f32 %v3236_v8, %v3287_v42 }
 0x5e0   :  { %v2036_v14 = vmul.f32 1.442695, %v2035_v0 }
 0x5e1   :  { %v3289_v44 = vpop.xlane.xlu1 %1771  ;;  %v3297_v6 = vpop.xlane.xlu0 %1950 }
 0x5e2   :  { %v1952_v7 = vsub.f32 %v3244_v11, %v3297_v6  ;;  %v1773_v20 = vsub.f32 %v3241_v9, %v3289_v44  ;;  %v2045_v11 = vsel %vm1675_vm8, %v2044_v19, 0.0 }
 0x5e4   :  { %v1953_v10 = vmul.f32 1.442695, %v1952_v7  ;;  %v1774_v8 = vmul.f32 1.442695, %v1773_v20 }
 0x5e5   :  { %v3291_v46 = vpop.xlane.xlu1 %2116  ;;  %v3303_v51 = vpop.xlane.xlu0 %1677 }
 0x5e6   :  { %2753 = vpow2.f32 %v1953_v10  ;;  %v1679_v16 = vsub.f32 %v3251_v13, %v3303_v51  ;;  %v1802_v13 = vsel %vm1801_vm12, %v3281_v26, -inf  ;;  %v3353_v10 = vsel %vm1665_vm10, %v3230_v1, -1e+30 }
 0x5e7   :  { %2755 = vpow2.f32 %v2036_v14  ;;  %v1803_v25 = vrot.slane %v1802_v13, 4 }
 0x5e8   :  { %v1680_v21 = vmul.f32 1.442695, %v1679_v16 }
 0x5e9   :  { %v2614_v47 = vpop.permute.xlu1 %2613  ;;  %v3314_v22 = vpop.xlane.xlu0 %1860  ;;  %v1804_v30 = vmax.f32 %v1802_v13, %v1803_v25 }
 0x5ea   :  { %v2615_v48 = vunpack.i.l.bf16 %v2614_v47  ;;  %v2616_v2 = vunpack.i.h.bf16 %v2614_v47  ;;  %2757 = vpow2.f32 %v1680_v21  ;;  %v1862_v24 = vsub.f32 %v3265_v18, %v3314_v22 }
 0x5eb   :  { %2759 = vpow2.f32 %v1774_v8  ;;  %v1805_v34 = vrot.slane %v1804_v30, 2 }
 0x5ec   :  { %v1734_v49 = vmul.f32 %v2615_v48, %v3281_v26  ;;  %v1863_v29 = vmul.f32 1.442695, %v1862_v24 }
 0x5ed   :  { %v1806_v38 = vmax.f32 %v1804_v30, %v1805_v34 }
 0x5ee   :  { %v1735_v54 = vsel %vm1709_vm11, %v1734_v49, 0.0  ;;  %2761 = vpow2.f32 %v1863_v29 }
 0x5ef   :  { %v1736_v53 = vrot.slane %v1735_v54, 4  ;;  %v1807_v43 = vrot.slane %v1806_v38, 1 }
 0x5f0   :  { %v2754_v28 = vpop.eup %2753 }
 0x5f1   :  { %v1737_v55 = vadd.f32 %v1736_v53, %v1735_v54  ;;  %v1955_v32 = vsel %vm1675_vm8, %v2754_v28, 0.0  ;;  %v2756_v33 = vpop.eup %2755  ;;  %v3330_v49 = vmax.f32 %v1806_v38, %v1807_v43  ;;  %v1896_v54 = vrot.slane %v1895_v45, 1  ;;  %v3357_v28 = vpop.xlane.xlu0 %1690 }
 0x5f2   :  { %v2038_v36 = vsel %vm1675_vm8, %v2756_v33, 0.0 }
 0x5f3   :  { %v1738_v57 = vrot.slane %v1737_v55, 2  ;;  %v3335_v56 = vmax.f32 %v1895_v45, %v1896_v54 }
 0x5f4   :  { %v2758_v37 = vpop.eup %2757 }
 0x5f5   :  { %v1739_v59 = vadd.f32 %v1738_v57, %v1737_v55  ;;  %v1682_v40 = vsel %vm1675_vm8, %v2758_v37, 0.0  ;;  %v2760_v41 = vpop.eup %2759  ;;  %v1809_v55 = vsub.f32 %v3281_v26, %v3330_v49  ;;  %v1898_v58 = vsub.f32 %v3281_v26, %v3335_v56 }
 0x5f6   :  { %v1776_v47 = vsel %vm1675_vm8, %v2760_v41, 0.0 }
 0x5f7   :  { %v1740_v60 = vrot.slane %v1739_v59, 1  ;;  %v1810_v57 = vmul.f32 1.442695, %v1809_v55 }
 0x5f8   :  { %v2762_v48 = vpop.eup %2761 }
 0x5f9   :  { %v1741_v62 = vadd.f32 %v1740_v60, %v1739_v59  ;;  %v1865_v53 = vsel %vm1675_vm8, %v2762_v48, 0.0  ;;  %2763 = vpow2.f32 %v1810_v57  ;;  %v1899_v59 = vmul.f32 1.442695, %v1898_v58 }
 0x5fb   :  { %v1742_v3 = vsub.f32 %v1729_v61, %v1741_v62  ;;  %2765 = vpow2.f32 %v1899_v59 }
 0x5fd   :  { %v1747_v4 = vmul.f32 %v2616_v2, %v1742_v3  ;;  %v3343_v2 = vsel %vm1665_vm10, %v3223_v63, -1e+30  ;;  %v2147_v63 = vsel %vm1890_vm13, %v3353_v10, -inf }
 0x5fe   :  { %v1981_v7 = vsel %vm1801_vm12, %v3343_v2, -inf  ;;  %v2063_v0 = vsel %vm1890_vm13, %v3343_v2, -inf }
 0x5ff   :  { %1749 = vrot.lane.b32.xlu0 %v1747_v4, %s2879_s7  ;;  %v1982_v16 = vrot.slane %v1981_v7, 4 }
 0x601   :  { %v1983_v21 = vmax.f32 %v1981_v7, %v1982_v16 }
 0x603   :  { %2618 = vrot.lane.b32.xlu0 %v2612_v23, %s2874_s10  ;;  %v2764_v60 = vpop.eup %2763  ;;  %v1984_v24 = vrot.slane %v1983_v21, 2 }
 0x604   :  { %v1812_v61 = vsel %vm1801_vm12, %v2764_v60, 0.0 }
 0x605   :  { %v2766_v62 = vpop.eup %2765  ;;  %v1813_v3 = vrot.slane %v1812_v61, 4  ;;  %v1985_v29 = vmax.f32 %v1983_v21, %v1984_v24 }
 0x606   :  { %v1901_v4 = vsel %vm1890_vm13, %v2766_v62, 0.0 }
 0x607   :  { %2623 = vrot.lane.b32.xlu0 %v2612_v23, %s2882_s4  ;;  %v2127_v23 = vmul.f32 %v3262_v5, %v3255_v15  ;;  %v1814_v12 = vadd.f32 %v1813_v3, %v1812_v61  ;;  %v1902_v14 = vrot.slane %v1901_v4, 4  ;;  %v1986_v35 = vrot.slane %v1985_v29, 1 }
 0x609   :  { %v2128_v9 = vsel %vm1675_vm8, %v2127_v23, 0.0  ;;  %v1815_v19 = vrot.slane %v1814_v12, 2  ;;  %v1903_v20 = vadd.f32 %v1902_v14, %v1901_v4  ;;  %v3361_v39 = vmax.f32 %v1985_v29, %v1986_v35 }
 0x60b   :  { %v1816_v13 = vadd.f32 %v1815_v19, %v1814_v12  ;;  %v1904_v8 = vrot.slane %v1903_v20, 2  ;;  %v1988_v48 = vsub.f32 %v3343_v2, %v3361_v39 }
 0x60d   :  { %v1817_v27 = vrot.slane %v1816_v13, 1  ;;  %v1905_v1 = vadd.f32 %v1904_v8, %v1903_v20  ;;  %v1989_v61 = vmul.f32 1.442695, %v1988_v48 }
 0x60f   :  { %v1906_v33 = vrot.slane %v1905_v1, 1 }
 0x611   :  { %v1907_v38 = vadd.f32 %v1906_v33, %v1905_v1 }
 0x626   :  { %1963 = vadd.xlane.f32.xlu0 %v1962_v17  ;;  %v2064_v17 = vrot.slane %v2063_v0, 4 }
 0x628   :  { %v2065_v23 = vmax.f32 %v2063_v0, %v2064_v17 }
 0x62a   :  { %2046 = vadd.xlane.f32.xlu0 %v2045_v11  ;;  %v2148_v11 = vrot.slane %v2147_v63, 4 }
 0x62c   :  { %v2149_v25 = vmax.f32 %v2147_v63, %v2148_v11 }
 0x62e   :  { %2129 = vadd.xlane.f32.xlu0 %v2128_v9  ;;  %v2066_v9 = vrot.slane %v2065_v23, 2  ;;  %v2150_v30 = vrot.slane %v2149_v25, 2 }
 0x630   :  { %v2067_v31 = vmax.f32 %v2065_v23, %v2066_v9 }
 0x632   :  { %1956 = vadd.xlane.f32.xlu0 %v1955_v32  ;;  %v1818_v32 = vadd.f32 %v1817_v27, %v1816_v13  ;;  %v2068_v37 = vrot.slane %v2067_v31, 1 }
 0x634   :  { %2767 = vlog2.f32 %v1818_v32  ;;  %v3366_v45 = vmax.f32 %v2067_v31, %v2068_v37 }
 0x635   :  { %2769 = vlog2.f32 %v1907_v38 }
 0x636   :  { %2039 = vadd.xlane.f32.xlu0 %v2038_v36  ;;  %v2151_v36 = vmax.f32 %v2149_v25, %v2150_v30  ;;  %v2070_v59 = vsub.f32 %v3343_v2, %v3366_v45  ;;  %2771 = vpow2.f32 %v1989_v61 }
 0x638   :  { %v2152_v41 = vrot.slane %v2151_v36, 1  ;;  %v2071_v14 = vmul.f32 1.442695, %v2070_v59 }
 0x63a   :  { %1683 = vadd.xlane.f32.xlu0 %v1682_v40  ;;  %2773 = vpow2.f32 %v2071_v14 }
 0x63e   :  { %1777 = vadd.xlane.f32.xlu0 %v1776_v47  ;;  %v2768_v3 = vpop.eup %2767 }
 0x63f   :  { %v1820_v16 = vmul.f32 0.6931472, %v2768_v3  ;;  %v2770_v19 = vpop.eup %2769 }
 0x640   :  { %v1909_v13 = vmul.f32 0.6931472, %v2770_v19  ;;  %v2772_v30 = vpop.eup %2771 }
 0x641   :  { %v1991_v35 = vsel %vm1801_vm12, %v2772_v30, 0.0 }
 0x642   :  { %1866 = vadd.xlane.f32.xlu0 %v1865_v53  ;;  %v3373_v53 = vmax.f32 %v2151_v36, %v2152_v41  ;;  %v1910_v1 = vadd.f32 %v1909_v13, %v3335_v56  ;;  %v1992_v38 = vrot.slane %v1991_v35, 4 }
 0x644   :  { %v2154_v4 = vsub.f32 %v3353_v10, %v3373_v53  ;;  %v2774_v32 = vpop.eup %2773 }
 0x645   :  { %v2073_v37 = vsel %vm1890_vm13, %v2774_v32, 0.0 }
 0x646   :  { %v2155_v20 = vmul.f32 1.442695, %v2154_v4  ;;  %v2074_v41 = vrot.slane %v2073_v37, 4 }
 0x648   :  { %2775 = vpow2.f32 %v2155_v20 }
 0x652   :  { %v2776_v36 = vpop.eup %2775 }
 0x653   :  { %v2157_v56 = vsel %vm1890_vm13, %v2776_v36, 0.0 }
 0x654   :  { %v2158_v48 = vrot.slane %v2157_v56, 4 }
 0x656   :  { %v2159_v59 = vadd.f32 %v2158_v48, %v2157_v56 }
 0x658   :  { %v2160_v3 = vrot.slane %v2159_v59, 2 }
 0x65a   :  { %v2161_v14 = vadd.f32 %v2160_v3, %v2159_v59 }
 0x671   :  { %v3359_v34 = vpop.permute.xlu0 %1749 }
 0x672   :  { %v1753_v32 = vsel %vm1752_vm14, %v3359_v34, 0.0 }
 0x675   :  { %v3363_v40 = vpop.permute.xlu0 %2618 }
 0x676   :  { %v2620_v43 = vunpack.i.l.bf16 %v3363_v40  ;;  %v2621_v24 = vunpack.i.h.bf16 %v3363_v40 }
 0x678   :  { %v1825_v47 = vmul.f32 %v2620_v43, %v3281_v26  ;;  %v2001_v4 = vmul.f32 %v2620_v43, %v3343_v2 }
 0x679   :  { %v2624_v54 = vpop.permute.xlu0 %2623 }
 0x67a   :  { %v1826_v55 = vsel %vm1801_vm12, %v1825_v47, 0.0  ;;  %v3376_v57 = vunpack.i.l.bf16 %v2624_v54  ;;  %v3390_v31 = vunpack.i.h.bf16 %v2624_v54  ;;  %v1993_v47 = vadd.f32 %v1992_v38, %v1991_v35 }
 0x67b   :  { %v1827_v58 = vrot.slane %v1826_v55, 4  ;;  %v2075_v54 = vadd.f32 %v2074_v41, %v2073_v37 }
 0x67c   :  { %v1914_v60 = vmul.f32 %v3376_v57, %v3281_v26  ;;  %v1821_v26 = vadd.f32 %v1820_v16, %v3330_v49  ;;  %v2002_v16 = vsel %vm1801_vm12, %v2001_v4, 0.0 }
 0x67d   :  { %v1828_v62 = vadd.f32 %v1827_v58, %v1826_v55  ;;  %v2118_v55 = vsub.f32 %v3255_v15, %v3291_v46  ;;  %v1994_v58 = vrot.slane %v1993_v47, 2  ;;  %v2003_v20 = vrot.slane %v2002_v16, 4 }
 0x67e   :  { %v1915_v7 = vsel %vm1890_vm13, %v1914_v60, 0.0  ;;  %v2076_v60 = vrot.slane %v2075_v54, 2 }
 0x67f   :  { %v1829_v0 = vrot.slane %v1828_v62, 2  ;;  %v1916_v12 = vrot.slane %v1915_v7, 4  ;;  %v2119_v61 = vmul.f32 1.442695, %v2118_v55 }
 0x681   :  { %v1830_v17 = vadd.f32 %v1829_v0, %v1828_v62  ;;  %v1917_v63 = vadd.f32 %v1916_v12, %v1915_v7  ;;  %v1995_v62 = vadd.f32 %v1994_v58, %v1993_v47  ;;  %v2083_v7 = vmul.f32 %v3376_v57, %v3343_v2 }
 0x682   :  { %v2077_v0 = vadd.f32 %v2076_v60, %v2075_v54  ;;  %2777 = vpow2.f32 %v2119_v61 }
 0x683   :  { %v1831_v21 = vrot.slane %v1830_v17, 1  ;;  %v1918_v11 = vrot.slane %v1917_v63, 2  ;;  %v1996_v12 = vrot.slane %v1995_v62, 1  ;;  %v2084_v15 = vsel %vm1890_vm13, %v2083_v7, 0.0 }
 0x685   :  { %v1832_v23 = vadd.f32 %v1831_v21, %v1830_v17  ;;  %v1919_v8 = vadd.f32 %v1918_v11, %v1917_v63  ;;  %v2167_v17 = vmul.f32 %v3376_v57, %v3353_v10  ;;  %v2078_v63 = vrot.slane %v2077_v0, 1 }
 0x686   :  { %v1997_v19 = vadd.f32 %v1996_v12, %v1995_v62  ;;  %v2085_v21 = vrot.slane %v2084_v15, 4 }
 0x687   :  { %v1833_v25 = vsub.f32 %v1821_v26, %v1832_v23  ;;  %v1920_v9 = vrot.slane %v1919_v8, 1  ;;  %v2168_v43 = vsel %vm1890_vm13, %v2167_v17, 0.0  ;;  %v2079_v11 = vadd.f32 %v2078_v63, %v2077_v0 }
 0x688   :  { %v2162_v26 = vrot.slane %v2161_v14, 1  ;;  %2779 = vlog2.f32 %v1997_v19  ;;  %v2004_v23 = vadd.f32 %v2003_v20, %v2002_v16  ;;  %v2086_v13 = vadd.f32 %v2085_v21, %v2084_v15 }
 0x689   :  { %v1837_v27 = vmul.f32 %v2621_v24, %v1833_v25  ;;  %v1921_v29 = vadd.f32 %v1920_v9, %v1919_v8  ;;  %v2169_v8 = vrot.slane %v2168_v43, 4  ;;  %v1871_v25 = vmul.f32 %v3262_v5, %v3265_v18 }
 0x68a   :  { %2781 = vlog2.f32 %v2079_v11  ;;  %v2163_v9 = vadd.f32 %v2162_v26, %v2161_v14  ;;  %v2005_v57 = vrot.slane %v2004_v23, 2 }
 0x68b   :  { %1839 = vrot.lane.b32.xlu1 %v1837_v27, %s2878_s3  ;;  %v1922_v49 = vsub.f32 %v1910_v1, %v1921_v29  ;;  %v2087_v27 = vrot.slane %v2086_v13, 2  ;;  %v2170_v1 = vadd.f32 %v2169_v8, %v2168_v43  ;;  %v1872_v29 = vsel %vm1675_vm8, %v1871_v25, 0.0  ;;  %v1785_v43 = vpop.xlane.xlu1 %1784 }
 0x68c   :  { %v2778_v2 = vpop.eup %2777  ;;  %2783 = vlog2.f32 %v2163_v9  ;;  %v2006_v30 = vadd.f32 %v2005_v57, %v2004_v23 }
 0x68d   :  { %v1926_v33 = vmul.f32 %v3390_v31, %v1922_v49  ;;  %v2121_v10 = vsel %vm1675_vm8, %v2778_v2, 0.0  ;;  %v2171_v49 = vrot.slane %v2170_v1, 2 }
 0x68e   :  { %v2007_v36 = vrot.slane %v2006_v30, 1 }
 0x68f   :  { %1928 = vrot.lane.b32.xlu0 %v1926_v33, %s2880_s8  ;;  %v2088_v33 = vadd.f32 %v2087_v27, %v2086_v13  ;;  %v2172_v38 = vadd.f32 %v2171_v49, %v2170_v1 }
 0x690   :  { %v2008_v54 = vadd.f32 %v2007_v36, %v2006_v30 }
 0x691   :  { %v2089_v37 = vrot.slane %v2088_v33, 1  ;;  %v2173_v58 = vrot.slane %v2172_v38, 1 }
 0x692   :  { %v2780_v5 = vpop.eup %2779 }
 0x693   :  { %v1999_v41 = vmul.f32 0.6931472, %v2780_v5  ;;  %v2090_v55 = vadd.f32 %v2089_v37, %v2088_v33  ;;  %v2174_v4 = vadd.f32 %v2173_v58, %v2172_v38 }
 0x694   :  { %v2782_v35 = vpop.eup %2781 }
 0x695   :  { %v2081_v47 = vmul.f32 0.6931472, %v2782_v35  ;;  %v2000_v34 = vadd.f32 %v1999_v41, %v3361_v39 }
 0x696   :  { %v2784_v48 = vpop.eup %2783 }
 0x697   :  { %v2082_v60 = vadd.f32 %v2081_v47, %v3366_v45  ;;  %v2165_v61 = vmul.f32 0.6931472, %v2784_v48  ;;  %v2009_v62 = vsub.f32 %v2000_v34, %v2008_v54 }
 0x699   :  { %v2091_v3 = vsub.f32 %v2082_v60, %v2090_v55  ;;  %v2166_v0 = vadd.f32 %v2165_v61, %v3373_v53  ;;  %v2010_v12 = vmul.f32 %v2621_v24, %v2009_v62 }
 0x69b   :  { %v2092_v14 = vmul.f32 %v3390_v31, %v2091_v3  ;;  %v2175_v16 = vsub.f32 %v2166_v0, %v2174_v4 }
 0x69d   :  { %v2176_v39 = vmul.f32 %v3390_v31, %v2175_v16  ;;  %v2341_v31 = vsel %vm1665_vm10, 1.0, %v2876_v50 }
 0x6ae   :  { %2122 = vadd.xlane.f32.xlu0 %v2121_v10 }
 0x6af   :  { %1873 = vadd.xlane.f32.xlu1 %v1872_v29 }
 0x6b3   :  { %v3416_v18 = vpop.xlane.xlu0 %1963  ;;  %1754 = vadd.xlane.f32.xlu1 %v1753_v32 }
 0x6b7   :  { %v3418_v56 = vpop.xlane.xlu0 %2046 }
 0x6bb   :  { %v3420_v59 = vpop.xlane.xlu0 %2129 }
 0x6bf   :  { %v1957_v7 = vpop.xlane.xlu0 %1956 }
 0x6c3   :  { %v2040_v15 = vpop.xlane.xlu0 %2039 }
 0x6c4   :  { %2785 = vlog2.f32 %v2040_v15  ;;  %2094 = vrot.lane.b32.xlu0 %v2092_v14, %s2880_s8  ;;  %2012 = vrot.lane.b32.xlu1 %v2010_v12, %s2878_s3 }
 0x6c7   :  { %v1684_v45 = vpop.xlane.xlu0 %1683 }
 0x6c8   :  { %2178 = vrot.lane.b32.xlu0 %v2176_v39, %s2880_s8 }
 0x6cb   :  { %v1778_v17 = vpop.xlane.xlu0 %1777 }
 0x6cc   :  { %2787 = vlog2.f32 %v1778_v17 }
 0x6cd   :  { %2789 = vlog2.f32 %v1684_v45 }
 0x6ce   :  { %v2786_v53 = vpop.eup %2785  ;;  %2791 = vlog2.f32 %v1957_v7 }
 0x6cf   :  { %v2042_v63 = vmul.f32 0.6931472, %v2786_v53  ;;  %v1867_v57 = vpop.xlane.xlu0 %1866 }
 0x6d0   :  { %2793 = vlog2.f32 %v1867_v57 }
 0x6d1   :  { %v2043_v40 = vadd.f32 %v2042_v63, %v3287_v42 }
 0x6d3   :  { %v2048_v24 = vsub.f32 %v2043_v40, %v3418_v56 }
 0x6d5   :  { %v2049_v48 = vmul.f32 %v2341_v31, %v2048_v24 }
 0x6d6   :  { %v2788_v19 = vpop.eup %2787 }
 0x6d7   :  { %v1780_v20 = vmul.f32 0.6931472, %v2788_v19  ;;  %v2790_v42 = vpop.eup %2789  ;;  %v2050_v34 = vsel %vm1694_vm15, %v2049_v48, 0.0 }
 0x6d8   :  { %v1686_v23 = vmul.f32 0.6931472, %v2790_v42  ;;  %v2792_v8 = vpop.eup %2791 }
 0x6d9   :  { %v1781_v21 = vadd.f32 %v1780_v20, %v3289_v44  ;;  %v1959_v25 = vmul.f32 0.6931472, %v2792_v8 }
 0x6da   :  { %v1687_v13 = vadd.f32 %v1686_v23, %v3303_v51 }
 0x6db   :  { %v1786_v11 = vsub.f32 %v1781_v21, %v1785_v43  ;;  %v1960_v10 = vadd.f32 %v1959_v25, %v3297_v6  ;;  %v2794_v6 = vpop.eup %2793 }
 0x6dc   :  { %v1692_v44 = vsub.f32 %v1687_v13, %v3357_v28  ;;  %v1869_v49 = vmul.f32 0.6931472, %v2794_v6 }
 0x6dd   :  { %v1787_v26 = vmul.f32 %v2341_v31, %v1786_v11  ;;  %v1965_v1 = vsub.f32 %v1960_v10, %v3416_v18 }
 0x6de   :  { %v1693_v52 = vmul.f32 %v2341_v31, %v1692_v44  ;;  %v1870_v33 = vadd.f32 %v1869_v49, %v3314_v22 }
 0x6df   :  { %v1788_v2 = vsel %vm1694_vm15, %v1787_v26, 0.0  ;;  %v1966_v30 = vmul.f32 %v2341_v31, %v1965_v1 }
 0x6e0   :  { %v1695_v27 = vsel %vm1694_vm15, %v1693_v52, 0.0 }
 0x6e1   :  { %v1967_v28 = vsel %vm1694_vm15, %v1966_v30, 0.0 }
 0x6e8   :  { %1789 = vadd.xlane.f32.xlu1 %v1788_v2 }
 0x6fd   :  { %v1840_v9 = vpop.permute.xlu1 %1839 }
 0x6fe   :  { %v1842_v50 = vsel %vm1752_vm14, %v1840_v9, 0.0 }
 0x6ff   :  { %1843 = vadd.xlane.f32.xlu0 %v1842_v50 }
 0x701   :  { %v1929_v29 = vpop.permute.xlu0 %1928 }
 0x702   :  { %v1931_v51 = vsel %vm1752_vm14, %v1929_v29, 0.0 }
 0x703   :  { %1696 = vadd.xlane.f32.xlu0 %v1695_v27 }
 0x707   :  { %1932 = vadd.xlane.f32.xlu0 %v1931_v51 }
 0x70b   :  { %1968 = vadd.xlane.f32.xlu0 %v1967_v28 }
 0x73b   :  { %v2123_v32 = vpop.xlane.xlu0 %2122 }
 0x73c   :  { %2795 = vlog2.f32 %v2123_v32  ;;  %v1874_v5 = vpop.xlane.xlu1 %1873 }
 0x73d   :  { %v1875_v35 = vsub.f32 %v1870_v33, %v1874_v5 }
 0x73f   :  { %v1876_v36 = vmul.f32 %v2341_v31, %v1875_v35  ;;  %v2095_v18 = vpop.permute.xlu0 %2094 }
 0x740   :  { %v1755_v37 = vpop.xlane.xlu1 %1754  ;;  %v2097_v41 = vsel %vm1752_vm14, %v2095_v18, 0.0 }
 0x741   :  { %v1877_v38 = vsel %vm1694_vm15, %v1876_v36, 0.0  ;;  %v1756_v7 = vrot.slane %v1755_v37, 4 }
 0x742   :  { %1878 = vadd.xlane.f32.xlu1 %v1877_v38 }
 0x743   :  { %v2179_v55 = vpop.permute.xlu0 %2178  ;;  %v1757_v12 = vadd.f32 %v1756_v7, %v1755_v37 }
 0x744   :  { %v2013_v56 = vpop.permute.xlu1 %2012  ;;  %v2181_v60 = vsel %vm1752_vm14, %v2179_v55, 0.0 }
 0x745   :  { %v2015_v47 = vsel %vm1752_vm14, %v2013_v56, 0.0  ;;  %v1758_v39 = vrot.slane %v1757_v12, 2 }
 0x746   :  { %v2796_v54 = vpop.eup %2795  ;;  %2098 = vadd.xlane.f32.xlu1 %v2097_v41  ;;  %2016 = vadd.xlane.f32.xlu0 %v2015_v47 }
 0x747   :  { %v2125_v22 = vmul.f32 0.6931472, %v2796_v54  ;;  %v1759_v24 = vadd.f32 %v1758_v39, %v1757_v12 }
 0x749   :  { %v2126_v58 = vadd.f32 %v2125_v22, %v3291_v46  ;;  %v1760_v43 = vrot.slane %v1759_v24, 1 }
 0x74a   :  { %2051 = vadd.xlane.f32.xlu0 %v2050_v34  ;;  %2182 = vadd.xlane.f32.xlu1 %v2181_v60 }
 0x74b   :  { %v2131_v61 = vsub.f32 %v2126_v58, %v3420_v59  ;;  %v1761_v42 = vadd.f32 %v1760_v43, %v1759_v24 }
 0x74d   :  { %v2132_v62 = vmul.f32 %v2341_v31, %v2131_v61 }
 0x74f   :  { %v2133_v3 = vsel %vm1694_vm15, %v2132_v62, 0.0 }
 0x750   :  { %2134 = vadd.xlane.f32.xlu0 %v2133_v3 }
 0x775   :  { %v1790_v4 = vpop.xlane.xlu1 %1789 }
 0x776   :  { %v1791_v0 = vrot.slane %v1790_v4, 4 }
 0x778   :  { %v1792_v16 = vadd.f32 %v1791_v0, %v1790_v4 }
 0x77a   :  { %v1793_v17 = vrot.slane %v1792_v16, 2 }
 0x77c   :  { %v1794_v19 = vadd.f32 %v1793_v17, %v1792_v16 }
 0x77e   :  { %v1795_v31 = vrot.slane %v1794_v19, 1 }
 0x780   :  { %v1796_v23 = vadd.f32 %v1795_v31, %v1794_v19 }
 0x78c   :  { %v1844_v14 = vpop.xlane.xlu0 %1843 }
 0x78d   :  { %v1845_v15 = vrot.slane %v1844_v14, 4 }
 0x78f   :  { %v1846_v46 = vadd.f32 %v1845_v15, %v1844_v14 }
 0x790   :  { %v1697_v45 = vpop.xlane.xlu0 %1696 }
 0x791   :  { %v1698_v53 = vrot.slane %v1697_v45, 4  ;;  %v1847_v63 = vrot.slane %v1846_v46, 2 }
 0x793   :  { %v1699_v40 = vadd.f32 %v1698_v53, %v1697_v45  ;;  %v1848_v20 = vadd.f32 %v1847_v63, %v1846_v46 }
 0x794   :  { %v1933_v8 = vpop.xlane.xlu0 %1932 }
 0x795   :  { %v1700_v59 = vrot.slane %v1699_v40, 2  ;;  %v1849_v26 = vrot.slane %v1848_v20, 1  ;;  %v1934_v44 = vrot.slane %v1933_v8, 4 }
 0x797   :  { %v1701_v21 = vadd.f32 %v1700_v59, %v1699_v40  ;;  %v1850_v13 = vadd.f32 %v1849_v26, %v1848_v20  ;;  %v1935_v10 = vadd.f32 %v1934_v44, %v1933_v8 }
 0x798   :  { %v1969_v25 = vpop.xlane.xlu0 %1968 }
 0x799   :  { %v1702_v11 = vrot.slane %v1701_v21, 1  ;;  %v1970_v9 = vrot.slane %v1969_v25, 4  ;;  %v1936_v52 = vrot.slane %v1935_v10, 2 }
 0x79b   :  { %v1703_v2 = vadd.f32 %v1702_v11, %v1701_v21  ;;  %v1971_v50 = vadd.f32 %v1970_v9, %v1969_v25  ;;  %v1937_v28 = vadd.f32 %v1936_v52, %v1935_v10 }
 0x79d   :  { %2573 = vpush %v1703_v2  ;;  %v1972_v1 = vrot.slane %v1971_v50, 2  ;;  %v1938_v38 = vrot.slane %v1937_v28, 1 }
 0x79e   :  { %2575 = vpush %v1761_v42 }
 0x79f   :  { %2577 = vpush %v1796_v23  ;;  %v1973_v33 = vadd.f32 %v1972_v1, %v1971_v50  ;;  %v1939_v3 = vadd.f32 %v1938_v38, %v1937_v28 }
 0x7a0   :  { %2579 = vpush %v1850_v13 }
 0x7a1   :  { %v1974_v55 = vrot.slane %v1973_v33, 1 }
 0x7a3   :  { %v1975_v0 = vadd.f32 %v1974_v55, %v1973_v33 }
 0x7ce   :  { %s2574_s10 = spop %2573 }
 0x7cf   :  { %v1879_v57 = vpop.xlane.xlu1 %1878  ;;  %s2576_s13 = spop %2575  ;;  %s1705_s14 = smul.f32 0.5, %s2574_s10 }
 0x7d0   :  { %v1880_v27 = vrot.slane %v1879_v57, 4  ;;  %s1763_s15 = smul.f32 0.5, %s2576_s13  ;;  %s2578_s17 = spop %2577 }
 0x7d1   :  { %s1706_s16 = smul.f32 0.5, %s1705_s14  ;;  %s2580_s20 = spop %2579 }
 0x7d2   :  { %v1881_v29 = vadd.f32 %v1880_v27, %v1879_v57  ;;  %s1764_s18 = smul.f32 0.5, %s1763_s15 }
 0x7d3   :  { %v2099_v51 = vpop.xlane.xlu1 %2098  ;;  %v2017_v30 = vpop.xlane.xlu0 %2016  ;;  %s1798_s19 = smul.f32 0.5, %s2578_s17 }
 0x7d4   :  { %v1882_v6 = vrot.slane %v1881_v29, 2  ;;  %v2100_v49 = vrot.slane %v2099_v51, 4  ;;  %v2018_v32 = vrot.slane %v2017_v30, 4  ;;  %s1765_s21 = sadd.f32 %s1764_s18, %s1706_s16  ;;  %s1852_s6 = smul.f32 0.5, %s2580_s20 }
 0x7d5   :  { %s1799_s22 = smul.f32 0.5, %s1798_s19 }
 0x7d6   :  { %v2101_v5 = vadd.f32 %v2100_v49, %v2099_v51  ;;  %v2019_v35 = vadd.f32 %v2018_v32, %v2017_v30  ;;  %v1883_v36 = vadd.f32 %v1882_v6, %v1881_v29  ;;  %s1853_s24 = smul.f32 0.5, %s1852_s6 }
 0x7d7   :  { %v2183_v18 = vpop.xlane.xlu1 %2182  ;;  %v2052_v37 = vpop.xlane.xlu0 %2051  ;;  %s1800_s23 = sadd.f32 %s1799_s22, %s1765_s21 }
 0x7d8   :  { %v2102_v56 = vrot.slane %v2101_v5, 2  ;;  %v2020_v41 = vrot.slane %v2019_v35, 2  ;;  %v2184_v47 = vrot.slane %v2183_v18, 4  ;;  %v2053_v48 = vrot.slane %v2052_v37, 4 }
 0x7d9   :  { %v1884_v54 = vrot.slane %v1883_v36, 1  ;;  %s1854_s25 = sadd.f32 %s1853_s24, %s1800_s23 }
 0x7da   :  { %v2185_v22 = vadd.f32 %v2184_v47, %v2183_v18  ;;  %v2054_v58 = vadd.f32 %v2053_v48, %v2052_v37  ;;  %v2021_v34 = vadd.f32 %v2020_v41, %v2019_v35  ;;  %v2103_v61 = vadd.f32 %v2102_v56, %v2101_v5 }
 0x7db   :  { %v1885_v60 = vadd.f32 %v1884_v54, %v1883_v36 }
 0x7dc   :  { %v2055_v62 = vrot.slane %v2054_v58, 2  ;;  %v2022_v4 = vrot.slane %v2021_v34, 1  ;;  %v2186_v7 = vrot.slane %v2185_v22, 2  ;;  %v2104_v46 = vrot.slane %v2103_v61, 1 }
 0x7dd   :  { %2581 = vpush %v1885_v60  ;;  %v2135_v12 = vpop.xlane.xlu0 %2134 }
 0x7de   :  { %2583 = vpush %v1939_v3  ;;  %v2136_v14 = vrot.slane %v2135_v12, 4  ;;  %v2023_v16 = vadd.f32 %v2022_v4, %v2021_v34  ;;  %v2056_v15 = vadd.f32 %v2055_v62, %v2054_v58  ;;  %v2187_v17 = vadd.f32 %v2186_v7, %v2185_v22 }
 0x7df   :  { %2585 = vpush %v1975_v0  ;;  %v2105_v40 = vadd.f32 %v2104_v46, %v2103_v61 }
 0x7e0   :  { %v2137_v39 = vadd.f32 %v2136_v14, %v2135_v12  ;;  %2587 = vpush %v2023_v16  ;;  %v2057_v45 = vrot.slane %v2056_v15, 1  ;;  %v2188_v59 = vrot.slane %v2187_v17, 1 }
 0x7e2   :  { %v2138_v53 = vrot.slane %v2137_v39, 2  ;;  %v2058_v63 = vadd.f32 %v2057_v45, %v2056_v15  ;;  %v2189_v21 = vadd.f32 %v2188_v59, %v2187_v17 }
 0x7e4   :  { %v2139_v24 = vadd.f32 %v2138_v53, %v2137_v39  ;;  %2589 = vpush %v2058_v63 }
 0x7e5   :  { %2591 = vpush %v2105_v40 }
 0x7e6   :  { %v2140_v19 = vrot.slane %v2139_v24, 1 }
 0x7e8   :  { %v2141_v20 = vadd.f32 %v2140_v19, %v2139_v24 }
 0x7ea   :  { %2593 = vpush %v2141_v20 }
 0x7eb   :  { %2595 = vpush %v2189_v21 }
 0x80e   :  { %s2582_s26 = spop %2581 }
 0x80f   :  { %s1887_s27 = smul.f32 0.5, %s2582_s26  ;;  %s2584_s28 = spop %2583 }
 0x810   :  { %s1941_s29 = smul.f32 0.5, %s2584_s28  ;;  %s2586_s1 = spop %2585 }
 0x811   :  { %s1888_s2 = smul.f32 0.5, %s1887_s27  ;;  %s2588_s30 = spop %2587 }
 0x812   :  { %s1942_s11 = smul.f32 0.5, %s1941_s29 }
 0x813   :  { %s1889_s12 = sadd.f32 %s1888_s2, %s1854_s25  ;;  %s1977_s5 = smul.f32 0.5, %s2586_s1 }
 0x814   :  { %s2025_s3 = smul.f32 0.5, %s2588_s30  ;;  %s2883_s25 = smov [#allocation7]  }
 0x815   :  { %s1943_s7 = sadd.f32 %s1942_s11, %s1889_s12  ;;  %s1978_s8 = smul.f32 0.5, %s1977_s5 }
 0x816   :  { %s2026_s0 = smul.f32 0.5, %s2025_s3  ;;  %s2590_s4 = spop %2589 }
 0x817   :  { %s1979_s10 = sadd.f32 %s1978_s8, %s1943_s7  ;;  %s2060_s13 = smul.f32 0.5, %s2590_s4 }
 0x818   :  { %s2592_s14 = spop %2591  ;;  %s2204_s26 = sshll.u32 %s2883_s25, 4  ;;  %s2205_s26 = int_to_ptr.vmem [resolvable:$true] %s2204_s26 }
 0x819   :  { %s2027_s15 = sadd.f32 %s2026_s0, %s1979_s10  ;;  %s2061_s16 = smul.f32 0.5, %s2060_s13 }
 0x81a   :  { %s2107_s17 = smul.f32 0.5, %s2592_s14  ;;  %s2841_s1 = scalar_lea.vmem %s2205_s26, 16 }
 0x81b   :  { %s2062_s18 = sadd.f32 %s2061_s16, %s2027_s15  ;;  %s2594_s19 = spop %2593 }
 0x81c   :  { %s2108_s20 = smul.f32 0.5, %s2107_s17  ;;  %s2596_s21 = spop %2595 }
 0x81d   :  { %s2143_s6 = smul.f32 0.5, %s2594_s19  ;;  %p2842_p2 = scmp.ne.s32.totalorder %s2205_s26, %s2841_s1 }
 0x81e   :  { %s2191_s22 = smul.f32 0.5, %s2596_s21  ;;  %s2109_s23 = sadd.f32 %s2108_s20, %s2062_s18 }
 0x81f   :  { %s2144_s24 = smul.f32 0.5, %s2143_s6  ;;  %s2845_s2 = scalar_lea.vmem %s2205_s26, 32 }
 0x820   :  { %s2192_s28 = smul.f32 0.5, %s2191_s22  ;;  %p2846_p3 = scmp.lt.s32.totalorder %s2205_s26, %s2205_s26 }
 0x821   :  { %s2145_s27 = sadd.f32 %s2144_s24, %s2109_s23  ;;  %p2847_p4 = scmp.lt.s32.totalorder %s2845_s2, %s2841_s1 }
 0x823   :  { %s2193_s29 = sadd.f32 %s2192_s28, %s2145_s27  ;;  %p2848_p5 = por %p2847_p4, %p2846_p3 }
 0x825   :  { %v2194_v43 = vstv %s2193_s29  ;;  %p2849_p6 = pnand %p2848_p5, %p2842_p2 }
 0x826   :  { %2195 = vst [vmem:[#allocation7] sm:$0x1] %v2194_v43 }
 0x827   :  { %2852 = shalt.err (!%p2849_p6)
}
 0x828   :  { %s2853_s12 = scalar_lea.hbm %s3477_s9, 16 }
 0x829   :  { %p2854_p7 = scmp.ne.s32.totalorder %s3477_s9, %s2853_s12  ;;  %p2857_p8 = scmp.lt.u32.totalorder %s2853_s12, %s3477_s9 }
 0x82b   :  { %p2859_p9 = pnand %p2857_p8, %p2854_p7 }
 0x82d   :  { %2862 = shalt.err (!%p2859_p9)
}
 0x82e   :  { %2207 = dma.vmem_to_hbm [thread:$0]  %s2205_s26, 16, %s3477_s9, [#allocation4]  }
 0x82f   :  { %2867 = dma.done.wait [#allocation4], 16  }
 0x830   :  { %2868 = vsyncadd [#allocation4], 4294967280 }
 0x831   :  { %2213 = vsyncpa [#allocation3], 1 }
 0x832   :  { %2214 = vsyncpa [#allocation6], 1 }
 0x833   :  { %2215 = vsyncpa [#allocation4], 1 }

</bundles_post_ra>
